<compile_context>
chip_gen: v6e
topology: v6e:2x2x1
jax: 0.10.0
libtpu: 0.0.40
codegen_flags: <defaults>
</compile_context>

<pallas_src>
import jax
import jax.numpy as jnp
from jax.experimental import pallas as pl
from jax.experimental.pallas import tpu as pltpu


def _drop_kernel(scale_ref, feat_ref, prop_ref, tokeep_ref, out_ref):
    feat = feat_ref[...]                      # (TB, Fp) f32
    prop = prop_ref[...]                      # (TB, 1)  f32  (>0, as in torch ref)
    to_keep = tokeep_ref[...]                 # (TB, 1)  f32  (integer-valued)
    tb, fp = feat.shape
    scale = scale_ref[0, 0]                   # scalar parameter from SMEM

    # before[b, k, j] = 1 iff element k sorts strictly before element j in a
    # stable ascending sort of row b.  k lives on sublanes, j on lanes.
    fj = feat[:, None, :]                                  # (TB, 1, Fp)
    fk = feat[:, :, None]                                  # (TB, Fp, 1)
    kk = jax.lax.broadcasted_iota(jnp.int32, (fp, fp), 0)  # (Fp_k, Fp_j)
    jj = jax.lax.broadcasted_iota(jnp.int32, (fp, fp), 1)
    tie = kk < jj                                          # hoisted 2-D tie-break
    before = (fk < fj) | ((fk == fj) & tie[None])          # (TB, Fp, Fp) bool

    # rank[b, j] = sum_k before[b, k, j]  -- done on the MXU: for each batch
    # row, a (1, Fp) ones vector times the (Fp, Fp) 0/1 matrix.  bf16 0/1 is
    # exact; f32 accumulation keeps the counts exact.  j stays on lanes.
    before_bf = jnp.where(before, 1.0, 0.0).astype(jnp.bfloat16)
    ones_lhs = jnp.ones((tb, 1, fp), jnp.bfloat16)
    rank = jnp.einsum("bik,bkj->bij", ones_lhs, before_bf,
                      preferred_element_type=jnp.float32)  # (TB, 1, Fp) f32

    keep = (rank < to_keep[:, :, None]).astype(jnp.float32)   # (TB, 1, Fp)
    row_scale = (scale / prop)[:, :, None]                    # (TB, 1, 1)
    out_ref[...] = feat[:, None, :] * keep * row_scale


def norm_active_adapt_drop(feat, prop, scale, *, tb=128):
    """Pallas implementation of NormActiveAdaptDropWithLoss.forward.

    feat: (B, F) float, prop: (B,) float in (0, 1], scale: scalar parameter.
    Note: prop == 0 yields inf/NaN, exactly like the PyTorch reference.
    """
    feat = jnp.asarray(feat, jnp.float32)
    b, f = feat.shape
    prop = jnp.asarray(prop, jnp.float32).reshape(b)
    scale2d = jnp.asarray(scale, jnp.float32).reshape(1, 1)

    # Lane-dense featsize: pad to a multiple of 128 with +inf (ranks last).
    fp = ((f + 127) // 128) * 128

    # Row tile: multiple of 8 (sublane tile), capped so the (tb, fp, fp)
    # comparison intermediates stay well inside VMEM on every generation
    # (v7x has only 64 MiB per TensorCore).  ~8 bytes/element live estimate.
    b8 = ((b + 7) // 8) * 8
    max_tb = max(8, (40 * 1024 * 1024) // (8 * fp * fp))
    tb = min(int(tb), max_tb, b8)
    tb = max(8, (tb // 8) * 8)
    bp = ((b + tb - 1) // tb) * tb            # batch padded to a tile multiple

    feat_p = feat
    if fp != f:
        feat_p = jnp.pad(feat_p, ((0, 0), (0, fp - f)),
                         constant_values=jnp.inf)
    prop_p = prop
    if bp != b:
        feat_p = jnp.pad(feat_p, ((0, bp - b), (0, 0)))
        prop_p = jnp.pad(prop_p, (0, bp - b), constant_values=1.0)

    prop2d = prop_p.reshape(bp, 1)
    # toKeep is defined with the TRUE featsize, not the padded one.
    tokeep2d = jnp.round(jnp.float32(f) * prop2d)

    out3 = pl.pallas_call(
        _drop_kernel,
        out_shape=jax.ShapeDtypeStruct((bp, 1, fp), jnp.float32),
        grid=(bp // tb,),
        in_specs=[
            pl.BlockSpec(memory_space=pltpu.MemorySpace.SMEM),  # scale (1,1)
            pl.BlockSpec((tb, fp), lambda i: (i, 0)),           # feat rows
            pl.BlockSpec((tb, 1), lambda i: (i, 0)),            # prop rows
            pl.BlockSpec((tb, 1), lambda i: (i, 0)),            # toKeep rows
        ],
        out_specs=pl.BlockSpec((tb, 1, fp), lambda i: (i, 0, 0)),
        compiler_params=pltpu.CompilerParams(
            dimension_semantics=("parallel",),
            vmem_limit_bytes=48 * 1024 * 1024),
    )(scale2d, feat_p, prop2d, tokeep2d)

    return out3[:b, 0, :f]


def _reference(feat, prop, scale):
    """Plain-JAX reference mirroring the PyTorch argsort-based forward."""
    b, f = feat.shape
    to_keep = jnp.round(f * prop).astype(jnp.int32)          # (B,)
    order = jnp.argsort(feat, axis=1)                         # ascending, stable
    ranks = jnp.argsort(order, axis=1)                        # rank of each element
    mask = (ranks < to_keep[:, None]).astype(feat.dtype)
    return feat * mask * (scale / prop)[:, None]


if __name__ == "__main__":
    featsize = 128
    batch = 16

    key = jax.random.PRNGKey(0)
    kf, _ = jax.random.split(key)
    feat = jax.random.normal(kf, (batch, featsize), dtype=jnp.float32)
    prop = jnp.linspace(0.1, 1.0, batch, dtype=jnp.float32)
    # Deterministic parameter init, as in nn.init.constant_(self.scale, 1.0)
    scale_param = jnp.ones((1,), dtype=jnp.float32)

    # tb=8 -> grid=(2,) "parallel": both v7x TensorCores get work.
    out = norm_active_adapt_drop(feat, prop, scale_param, tb=8)
    out = jax.block_until_ready(out)

    ref = _reference(feat, prop, scale_param[0])
    assert out.shape == ref.shape
    assert jnp.allclose(out, ref, atol=1e-5, rtol=1e-5), "mismatch vs reference"

    print("KERNEL_OK")
</pallas_src>

<mosaic_0001>
module attributes {stable_mosaic.version = 11 : i64} {
  func.func @_drop_kernel(%arg0: i32, %arg1: memref<1x1xf32, #tpu.memory_space<smem>>, %arg2: memref<8x128xf32, #tpu.memory_space<vmem>>, %arg3: memref<8x1xf32, #tpu.memory_space<vmem>>, %arg4: memref<8x1xf32, #tpu.memory_space<vmem>>, %arg5: memref<8x1x128xf32, #tpu.memory_space<vmem>>) attributes {dimension_semantics = [#tpu.dimension_semantics<parallel>], iteration_bounds = array<i64: 2>, scalar_prefetch = 0 : i64, scratch_operands = 0 : i64, tpu.core_type = #tpu.core_type<tc>, window_params = [{transform_indices = @transform_0, window_bounds = array<i64: 1, 1>}, {transform_indices = @transform_1, window_bounds = array<i64: 8, 128>}, {transform_indices = @transform_2, window_bounds = array<i64: 8, 1>}, {transform_indices = @transform_3, window_bounds = array<i64: 8, 1>}, {transform_indices = @transform_4, window_bounds = array<i64: 8, 1, 128>}]} {
    %c0 = arith.constant 0 : index
    %c0_0 = arith.constant 0 : index
    %0 = vector.load %arg2[%c0, %c0_0] : memref<8x128xf32, #tpu.memory_space<vmem>>, vector<8x128xf32>
    %c0_1 = arith.constant 0 : index
    %c0_2 = arith.constant 0 : index
    %1 = vector.load %arg3[%c0_1, %c0_2] : memref<8x1xf32, #tpu.memory_space<vmem>>, vector<8x1xf32>
    %c0_3 = arith.constant 0 : index
    %c0_4 = arith.constant 0 : index
    %2 = vector.load %arg4[%c0_3, %c0_4] : memref<8x1xf32, #tpu.memory_space<vmem>>, vector<8x1xf32>
    %c0_5 = arith.constant 0 : index
    %c0_6 = arith.constant 0 : index
    %3 = memref.load %arg1[%c0_5, %c0_6] : memref<1x1xf32, #tpu.memory_space<smem>>
    %4 = vector.shape_cast %0 : vector<8x128xf32> to vector<8x1x128xf32>
    %5 = vector.shape_cast %0 : vector<8x128xf32> to vector<8x128x1xf32>
    %6 = tpu.iota {dimensions = array<i32: 0>} : vector<128x128xi32>
    %7 = tpu.iota {dimensions = array<i32: 1>} : vector<128x128xi32>
    %8 = arith.cmpi slt, %6, %7 : vector<128x128xi32>
    %9 = vector.broadcast %5 : vector<8x128x1xf32> to vector<8x128x128xf32>
    %10 = vector.broadcast %4 : vector<8x1x128xf32> to vector<8x128x128xf32>
    %11 = arith.cmpf olt, %9, %10 : vector<8x128x128xf32>
    %12 = vector.broadcast %5 : vector<8x128x1xf32> to vector<8x128x128xf32>
    %13 = vector.broadcast %4 : vector<8x1x128xf32> to vector<8x128x128xf32>
    %14 = arith.cmpf oeq, %12, %13 : vector<8x128x128xf32>
    %15 = vector.shape_cast %8 : vector<128x128xi1> to vector<1x128x128xi1>
    %16 = vector.broadcast %15 : vector<1x128x128xi1> to vector<8x128x128xi1>
    %17 = arith.andi %14, %16 : vector<8x128x128xi1>
    %18 = arith.ori %11, %17 : vector<8x128x128xi1>
    %cst = arith.constant 1.000000e+00 : f32
    %cst_7 = arith.constant 0.000000e+00 : f32
    %19 = vector.broadcast %cst : f32 to vector<8x128x128xf32>
    %20 = vector.broadcast %cst_7 : f32 to vector<8x128x128xf32>
    %21 = arith.select %18, %19, %20 : vector<8x128x128xi1>, vector<8x128x128xf32>
    %22 = arith.truncf %21 : vector<8x128x128xf32> to vector<8x128x128xbf16>
    %cst_8 = arith.constant 1.000000e+00 : bf16
    %23 = vector.broadcast %cst_8 : bf16 to vector<8x1x128xbf16>
    "tpu.trace_start"() <{level = 10 : i32, message = "bik,bkj->bij"}> : () -> ()
    %cst_9 = arith.constant dense<0.000000e+00> : vector<8x1x128xf32>
    %24 = tpu.matmul %23, %22, %cst_9 {dimension_numbers = #tpu.dot_dimension_numbers<[2], [1], [1], [2], [0, 0, 0, 1, 1, 2], [0], [0]>} : vector<8x1x128xbf16>, vector<8x128x128xbf16>, vector<8x1x128xf32> -> vector<8x1x128xf32>
    "tpu.trace_stop"() : () -> ()
    %25 = vector.shape_cast %2 : vector<8x1xf32> to vector<8x1x1xf32>
    %26 = vector.broadcast %25 : vector<8x1x1xf32> to vector<8x1x128xf32>
    %27 = arith.cmpf olt, %24, %26 : vector<8x1x128xf32>
    %28 = arith.extui %27 : vector<8x1x128xi1> to vector<8x1x128xi32>
    %29 = arith.sitofp %28 : vector<8x1x128xi32> to vector<8x1x128xf32>
    %30 = vector.broadcast %3 : f32 to vector<8x1xf32>
    %31 = arith.divf %30, %1 : vector<8x1xf32>
    %32 = vector.shape_cast %31 : vector<8x1xf32> to vector<8x1x1xf32>
    %33 = vector.shape_cast %0 : vector<8x128xf32> to vector<8x1x128xf32>
    %34 = arith.mulf %33, %29 : vector<8x1x128xf32>
    %35 = vector.broadcast %32 : vector<8x1x1xf32> to vector<8x1x128xf32>
    %36 = arith.mulf %34, %35 : vector<8x1x128xf32>
    %c0_10 = arith.constant 0 : index
    %c0_11 = arith.constant 0 : index
    %c0_12 = arith.constant 0 : index
    %37 = vector.load %arg5[%c0_10, %c0_11, %c0_12] : memref<8x1x128xf32, #tpu.memory_space<vmem>>, vector<8x1x128xf32>
    tpu.vector_store %arg5[%c0_10, %c0_11, %c0_12], %36 {strides = array<i32>} : memref<8x1x128xf32, #tpu.memory_space<vmem>>, vector<8x1x128xf32>,
    return
  }
  func.func @transform_0(%arg0: i32) -> (i32, i32) {
    %c0_i32 = arith.constant 0 : i32
    %c0_i32_0 = arith.constant 0 : i32
    %c0_i32_1 = arith.constant 0 : i32
    return %c0_i32, %c0_i32_0 : i32, i32
  }
  func.func @transform_1(%arg0: i32) -> (i32, i32) {
    %c0_i32 = arith.constant 0 : i32
    %c0_i32_0 = arith.constant 0 : i32
    return %arg0, %c0_i32 : i32, i32
  }
  func.func @transform_2(%arg0: i32) -> (i32, i32) {
    %c0_i32 = arith.constant 0 : i32
    %c0_i32_0 = arith.constant 0 : i32
    return %arg0, %c0_i32 : i32, i32
  }
  func.func @transform_3(%arg0: i32) -> (i32, i32) {
    %c0_i32 = arith.constant 0 : i32
    %c0_i32_0 = arith.constant 0 : i32
    return %arg0, %c0_i32 : i32, i32
  }
  func.func @transform_4(%arg0: i32) -> (i32, i32, i32) {
    %c0_i32 = arith.constant 0 : i32
    %c0_i32_0 = arith.constant 0 : i32
    %c0_i32_1 = arith.constant 0 : i32
    return %arg0, %c0_i32, %c0_i32_0 : i32, i32, i32
  }
}

</mosaic_0001>

<bundles_post_ra>
// kernel: tpu_custom_call.1
= control target key start
LH: loop header
LB: loop body
LE: loop exit
PB: predicated region body
PF: predicated region fallthrough
CT: control target
= control target key end

     0   :  { %s4737_s0 = inlined_call_operand.<no memory space> [shape: f32[1,1], index: 0, kind: input, shape index: {}]   ;;  %s4738_s1 = inlined_call_operand.vmem [shape: f32[16,128], index: 1, kind: input, shape index: {}]   ;;  %s4739_s2 = inlined_call_operand.vmem [shape: f32[16,1], index: 2, kind: input, shape index: {}]   ;;  %s4740_s3 = inlined_call_operand.vmem [shape: f32[16,1], index: 3, kind: input, shape index: {}]   ;;  %s4741_s4 = inlined_call_operand.hbm [shape: f32[16,1,128], index: 4, kind: output, shape index: {}]  }
   0x1   :  { %9 = sst [smem:[#allocation2]] %s4737_s0 }
   0x2   :  { %10 = vsyncpa [#allocation4], 0 }
   0x3   :  { %12 = vsyncpa [#allocation4 + $0x1], 0  ;;  %s2874_s17 = smov 0   ;;  %s2876_s18 = smov 0  }
   0x4   :  { %s2878_s19 = smov 0   ;;  %s2880_s20 = smov 0  }
   0x5 LB: > { %s2895_s0 = sadd.s32 4294967295, %s2835_s20   ;;  %s2339_s21 = sadd.s32 4294967294, %s2835_s20   ;;  %s2835_s20 = sphi %s2880_s20, %s4968_s20   ;;  %s2831_s19 = sphi %s2878_s19, %s4967_s19   ;;  %s2827_s18 = sphi %s2876_s18, %s4966_s18   ;;  %s2823_s17 = sphi %s2874_s17, %s4965_s17  }
   0x6   : > { %s2899_s22 = sadd.s32 1, %s2835_s20   ;;  %s124_s23 = sadd.s32 1, %s2831_s19 }
   0x7   : > { %s121_s24 = ssub.s32 %s2835_s20, %s2899_s22  ;;  %p134_p0 = scmp.ne.s32.totalorder %s2831_s19, %s2827_s18 }
   0x8   : > { %p122_p1 = scmp.eq.s32.totalorder %s121_s24, 0  ;;  %p135_p2 = scmp.eq.s32.totalorder %s2895_s0, 1 }
   0x9   : > { %p140_p3 = scmp.ne.s32.totalorder %s2827_s18, %s2823_s17  ;;  %p141_p4 = scmp.eq.s32.totalorder %s2339_s21, 1 }
   0xa   : > { %s2910_s25 = scalar_select %p122_p1, %s2831_s19, %s124_s23  }
   0xb   : > { %p2912_p5 = por %p135_p2, %p134_p0  ;;  %p2916_p6 = por %p141_p4, %p140_p3 }
   0xc   : > { %p2342_p7 = scmp.ge.s32.totalorder %s2835_s20, 1  ;;  %p183_p8 = scmp.lt.s32.totalorder %s2835_s20, 3 }
   0xe   : > { %p184_p9 = pnand %p2342_p7, %p183_p8 }
   0xf   : > { %p216_p10 = scmp.lt.s32.totalorder (!%p184_p9), %s2895_s0, 1  ;;  %s3933_s13 = sld [smem:[#allocation2]] (!%p184_p9) }
  0x10   : > { %187 = sbr.rel (%p184_p9) target bundleno = 681 (0x2a9), region = 36  ;;  %s213_s14 = sand.u32 (!%p184_p9), 1, %s2827_s18  }
  0x11   : > { %s2343_s15 = sshll.u32 (!%p184_p9), %s213_s14, 3  ;;  %s2488_s21 = sshll.u32 (!%p184_p9), %s2895_s0, 7 }
  0x12   : > { %s4580_s16 = scalar_lea.vmem (!%p184_p9), [#allocation3], %s2343_s15  ;;  %s2843_s5 = smov (!%p184_p9), [#allocation3]  }
  0x13   : > { %s2253_s23 = sshll.u32 (!%p184_p9), %s4580_s16, 4  ;;  %s4692_s23 = int_to_ptr.vmem [resolvable:$true] %s2253_s23 }
  0x14   : > { %s2775_s30 = scalar_lea.vmem (!%p184_p9), %s4692_s23, 128 }
  0x15   : > { %v240_v0 = vlaneseq  ;;  %s217_s28 = scalar_select %p216_p10, %s2895_s0, 1  ;;  %v2837_v2 = vmov 0.0   ;;  %vm4742_vm0 = vmmov 0   ;;  %v2839_v12 = vmov 1966171168  }
  0x16   : > { %2561 = vmatprep.subr.bf16.mxu0 %v2837_v2  ;;  %2581 = vmatprep.subr.bf16.mxu1 %v2837_v2  ;;  %v238_v13 = vunpack.c.l.s4 %v2839_v12  ;;  %v4801_v25 = vmov 0  ;;  %v4803_v29 = vmov 0  ;;  %v4811_v37 = vmov 0  ;;  %s4697_s0 = scalar_lea.sflag [#allocation4], %s213_s14  ;;  %p2776_p11 = scmp.ne.s32.totalorder %s4692_s23, %s2775_s30 }
  0x17   : > { %v2925_v1 = vshrl.u32 %v240_v0, 7  ;;  %s2929_s29 = sshll.u32 %s217_s28, 3  ;;  %2577 = vmatprep.mubr.msk.bf16.mxu0 %vm4742_vm0, %v2837_v2  ;;  %2597 = vmatprep.mubr.msk.bf16.mxu1 %vm4742_vm0, %v2837_v2  ;;  %v2995_v20 = vand.u32 127, %v240_v0  ;;  %v4813_v39 = vmov 0  ;;  %v2840_v42 = vmov 1.0|1.0  }
  0x18   : > { %s2939_s6 = scalar_lea.vmem %s4738_s1, %s2929_s29  ;;  %v239_v14 = vunpack.c.0.s8 %v238_v13  ;;  %v4823_v53 = vmov 0  ;;  %v4825_v55 = vmov 0  ;;  %v4859_v45 = vmov 0  ;;  %s227_s9 = scalar_lea.vmem %s4740_s3, %s2929_s29 }
  0x19   : > { %v2932_v3 = vsub.s32 0, %v2925_v1  ;;  %v362_v4 = vsub.s32 1, %v2925_v1  ;;  %v2942_v5 = vld [vmem:[%s2939_s6] sm:$0xff]  ;;  %v429_v8 = vsub.s32 2, %v2925_v1  ;;  %v496_v10 = vsub.s32 3, %v2925_v1  ;;  %s223_s12 = scalar_lea.vmem %s4739_s2, %s2929_s29  ;;  %s4690_s29 = scalar_lea.hbm %s4741_s4, %s2488_s21 }
  0x1a   : > { %v2976_v15 = vsub.s32 %v239_v14, %v2925_v1  ;;  %v844_v21 = vadd.s32 112, %v2925_v1  ;;  %v845_v24 = vadd.s32 120, %v2925_v1  ;;  %v843_v28 = vadd.s32 104, %v2925_v1  ;;  %p2777_p12 = pnand %p2776_p11, %p2912_p5 }
  0x1b   : > { %v363_v6 = vrot.slane %v2942_v5, %v362_v4  ;;  %v296_v7 = vrot.slane %v2942_v5, %v2932_v3  ;;  %v2949_v9 = vrot.slane %v2942_v5, %v429_v8  ;;  %v2954_v11 = vrot.slane %v2942_v5, %v496_v10 }
  0x1c   : > { %v243_v16 = vrot.slane %v2942_v5, %v2976_v15  ;;  %vm3010_vm1 = vcmp.lt.s32.totalorder %v844_v21, %v2995_v20  ;;  %vm3024_vm7 = vcmp.lt.s32.totalorder %v845_v24, %v2995_v20  ;;  %v842_v32 = vadd.s32 96, %v2925_v1  ;;  %p2778_p13 = pneg %p2777_p12 }
  0x1d   : > { %421 = vbcast.lane.b32.xlu1 %v363_v6, 368  ;;  %354 = vbcast.lane.b32.xlu0 %v296_v7, 368  ;;  %v4802_v25 = vsel %vm3010_vm1, 4294967295, %v4801_v25  ;;  %v4804_v29 = vsel %vm3024_vm7, 4294967295, %v4803_v29  ;;  %v563_v36 = vsub.s32 4, %v2925_v1  ;;  %vm3052_vm15 = vcmp.lt.s32.totalorder %v843_v28, %v2995_v20 }
  0x1e   : > { %v251_v17 = vcombine.high %v243_v16, %v243_v16  ;;  %v2987_v18 = vrot.slane %v243_v16, %v2976_v15  ;;  %v4812_v37 = vsel %vm3052_vm15, 4294967295, %v4811_v37  ;;  %v630_v44 = vsub.s32 5, %v2925_v1 }
  0x1f   : > { %v3077_v43 = vrot.slane %v2942_v5, %v563_v36  ;;  %v841_v47 = vadd.s32 88, %v2925_v1  ;;  %v840_v49 = vadd.s32 80, %v2925_v1  ;;  %v839_v61 = vadd.s32 72, %v2925_v1 }
  0x20   : > { %v2990_v19 = vrot.slane %v251_v17, %v2976_v15  ;;  %v3000_v22 = vrot.slane %v2987_v18, %v2932_v3  ;;  %v3107_v51 = vrot.slane %v2942_v5, %v630_v44  ;;  %v838_v62 = vadd.s32 64, %v2925_v1 }
  0x21   : > { %425 = vbcast.lane.b32.xlu1 %v363_v6, 376  ;;  %358 = vbcast.lane.b32.xlu0 %v296_v7, 376  ;;  %v4837_v8 = vmov 0  ;;  %v837_v13 = vadd.s32 56, %v2925_v1  ;;  %v836_v16 = vadd.s32 48, %v2925_v1  ;;  %v4849_v28 = vmov 0 }
  0x22   : > { %v3004_v23 = vrot.slane %v2990_v19, %v2932_v3  ;;  %v835_v35 = vadd.s32 40, %v2925_v1  ;;  %v834_v36 = vadd.s32 32, %v2925_v1  ;;  %v833_v52 = vadd.s32 24, %v2925_v1 }
  0x23   : > { %v831_v10 = vadd.s32 8, %v2925_v1  ;;  %v3463_v21 = vcombine.high %v2987_v18, %v2987_v18 }
  0x25   : > { %350 = vbcast.lane.b32.xlu1 %v296_v7, 360  ;;  %346 = vbcast.lane.b32.xlu0 %v296_v7, 352 }
  0x29   : > { %417 = vbcast.lane.b32.xlu1 %v363_v6, 360  ;;  %413 = vbcast.lane.b32.xlu0 %v363_v6, 352 }
  0x2d   : > { %342 = vbcast.lane.b32.xlu1 %v296_v7, 344  ;;  %338 = vbcast.lane.b32.xlu0 %v296_v7, 336 }
  0x31   : > { %409 = vbcast.lane.b32.xlu1 %v363_v6, 344  ;;  %405 = vbcast.lane.b32.xlu0 %v363_v6, 336 }
  0x35   : > { %334 = vbcast.lane.b32.xlu1 %v296_v7, 328  ;;  %330 = vbcast.lane.b32.xlu0 %v296_v7, 320 }
  0x39   : > { %401 = vbcast.lane.b32.xlu1 %v363_v6, 328  ;;  %397 = vbcast.lane.b32.xlu0 %v363_v6, 320 }
  0x3d   : > { %326 = vbcast.lane.b32.xlu1 %v296_v7, 312  ;;  %322 = vbcast.lane.b32.xlu0 %v296_v7, 304 }
  0x41   : > { %393 = vbcast.lane.b32.xlu1 %v363_v6, 312  ;;  %389 = vbcast.lane.b32.xlu0 %v363_v6, 304 }
  0x45   : > { %318 = vbcast.lane.b32.xlu1 %v296_v7, 296  ;;  %314 = vbcast.lane.b32.xlu0 %v296_v7, 288 }
  0x49   : > { %385 = vbcast.lane.b32.xlu1 %v363_v6, 296  ;;  %381 = vbcast.lane.b32.xlu0 %v363_v6, 288 }
  0x4d   : > { %310 = vbcast.lane.b32.xlu1 %v296_v7, 280  ;;  %306 = vbcast.lane.b32.xlu0 %v296_v7, 272 }
  0x51   : > { %377 = vbcast.lane.b32.xlu1 %v363_v6, 280  ;;  %373 = vbcast.lane.b32.xlu0 %v363_v6, 272 }
  0x55   : > { %302 = vbcast.lane.b32.xlu1 %v296_v7, 264  ;;  %298 = vbcast.lane.b32.xlu0 %v296_v7, 256  ;;  %v4835_v7 = vmov 0 }
  0x59   : > { %369 = vbcast.lane.b32.xlu1 %v363_v6, 264  ;;  %365 = vbcast.lane.b32.xlu0 %v363_v6, 256 }
  0x5d   : > { %492 = vbcast.lane.b32.xlu1 %v2949_v9, 376  ;;  %488 = vbcast.lane.b32.xlu0 %v2949_v9, 368 }
  0x61   : > { %559 = vbcast.lane.b32.xlu1 %v2954_v11, 376  ;;  %555 = vbcast.lane.b32.xlu0 %v2954_v11, 368 }
  0x65   : > { %484 = vbcast.lane.b32.xlu1 %v2949_v9, 360  ;;  %480 = vbcast.lane.b32.xlu0 %v2949_v9, 352 }
  0x69   : > { %551 = vbcast.lane.b32.xlu1 %v2954_v11, 360  ;;  %547 = vbcast.lane.b32.xlu0 %v2954_v11, 352 }
  0x6d   : > { %476 = vbcast.lane.b32.xlu1 %v2949_v9, 344  ;;  %472 = vbcast.lane.b32.xlu0 %v2949_v9, 336 }
  0x71   : > { %543 = vbcast.lane.b32.xlu1 %v2954_v11, 344  ;;  %539 = vbcast.lane.b32.xlu0 %v2954_v11, 336 }
  0x75   : > { %468 = vbcast.lane.b32.xlu1 %v2949_v9, 328  ;;  %464 = vbcast.lane.b32.xlu0 %v2949_v9, 320 }
  0x79   : > { %535 = vbcast.lane.b32.xlu1 %v2954_v11, 328  ;;  %531 = vbcast.lane.b32.xlu0 %v2954_v11, 320 }
  0x7d   : > { %460 = vbcast.lane.b32.xlu1 %v2949_v9, 312  ;;  %456 = vbcast.lane.b32.xlu0 %v2949_v9, 304 }
  0x81   : > { %527 = vbcast.lane.b32.xlu1 %v2954_v11, 312  ;;  %523 = vbcast.lane.b32.xlu0 %v2954_v11, 304 }
  0x85   : > { %452 = vbcast.lane.b32.xlu1 %v2949_v9, 296  ;;  %448 = vbcast.lane.b32.xlu0 %v2949_v9, 288 }
  0x89   : > { %519 = vbcast.lane.b32.xlu1 %v2954_v11, 296  ;;  %515 = vbcast.lane.b32.xlu0 %v2954_v11, 288 }
  0x8d   : > { %444 = vbcast.lane.b32.xlu1 %v2949_v9, 280  ;;  %440 = vbcast.lane.b32.xlu0 %v2949_v9, 272 }
  0x8f   : > { %v422_v26 = vpop.permute.xlu1 %421  ;;  %v355_v27 = vpop.permute.xlu0 %354 }
  0x90   : > { %vm1062_vm2 = vcmp.eq.f32.partialorder %v422_v26, %v3004_v23  ;;  %vm918_vm3 = vcmp.lt.f32.partialorder %v355_v27, %v3000_v22  ;;  %vm1046_vm4 = vcmp.eq.f32.partialorder %v355_v27, %v3000_v22  ;;  %vm934_vm5 = vcmp.lt.f32.partialorder %v422_v26, %v3004_v23 }
  0x91   : > { %511 = vbcast.lane.b32.xlu1 %v2954_v11, 280  ;;  %vm1206_vm6 = vmand %vm1046_vm4, %vm3010_vm1  ;;  %507 = vbcast.lane.b32.xlu0 %v2954_v11, 272  ;;  %v4847_v26 = vmov 0 }
  0x92   : > { %vm3028_vm8 = vmor %vm918_vm3, %vm1206_vm6  ;;  %vm3059_vm3 = vcmp.lt.s32.totalorder %v842_v32, %v2995_v20  ;;  %v3496_v32 = vrot.slane %v3463_v21, %v2932_v3 }
  0x93   : > { %v426_v31 = vpop.permute.xlu1 %425  ;;  %vm1222_vm9 = vmand %vm1062_vm2, %vm3010_vm1  ;;  %v359_v33 = vpop.permute.xlu0 %358  ;;  %v4814_v39 = vsel %vm3059_vm3, 4294967295, %v4813_v39 }
  0x94   : > { %vm1063_vm10 = vcmp.eq.f32.partialorder %v426_v31, %v3004_v23  ;;  %vm3036_vm11 = vmor %vm934_vm5, %vm1222_vm9  ;;  %vm919_vm12 = vcmp.lt.f32.partialorder %v359_v33, %v3000_v22  ;;  %vm1047_vm13 = vcmp.eq.f32.partialorder %v359_v33, %v3000_v22  ;;  %vm935_vm5 = vcmp.lt.f32.partialorder %v426_v31, %v3004_v23 }
  0x95   : > { %436 = vbcast.lane.b32.xlu1 %v2949_v9, 264  ;;  %vm3045_vm14 = vmand %vm1063_vm10, %vm3024_vm7  ;;  %432 = vbcast.lane.b32.xlu0 %v2949_v9, 256  ;;  %v697_v31 = vsub.s32 6, %v2925_v1 }
  0x96   : > { %vm1207_vm2 = vmand %vm1047_vm13, %vm3024_vm7 }
  0x97   : > { %v351_v38 = vpop.permute.xlu1 %350  ;;  %vm1335_vm4 = vmor %vm919_vm12, %vm1207_vm2  ;;  %v347_v40 = vpop.permute.xlu0 %346 }
  0x98   : > { %vm1045_vm6 = vcmp.eq.f32.partialorder %v351_v38, %v3000_v22  ;;  %vm2347_vm9 = vmpackc.low %vm1335_vm4, %vm3028_vm8  ;;  %vm1044_vm13 = vcmp.eq.f32.partialorder %v347_v40, %v3000_v22  ;;  %vm916_vm2 = vcmp.lt.f32.partialorder %v347_v40, %v3000_v22 }
  0x99   : > { %vm3069_vm10 = vmand %vm1045_vm6, %vm3052_vm15  ;;  %2562 = vmatpush3.bf16.msk.msra.mxu0 %vm2347_vm9, %v2840_v42  ;;  %503 = vbcast.lane.b32.xlu1 %v2954_v11, 264  ;;  %vm917_vm9 = vcmp.lt.f32.partialorder %v351_v38, %v3000_v22 }
  0x9a   : > { %vm3082_vm8 = vmand %vm1044_vm13, %vm3059_vm3  ;;  %499 = vbcast.lane.b32.xlu0 %v2954_v11, 256  ;;  %2563 = vmatprep.subr.bf16.mxu0 %v2837_v2 }
  0x9b   : > { %vm1351_vm12 = vmor %vm935_vm5, %vm3045_vm14  ;;  %v418_v46 = vpop.permute.xlu1 %417  ;;  %v414_v48 = vpop.permute.xlu0 %413 }
  0x9c   : > { %vm2363_vm4 = vmpackc.low %vm1351_vm12, %vm3036_vm11  ;;  %vm1061_vm6 = vcmp.eq.f32.partialorder %v418_v46, %v3004_v23  ;;  %vm1060_vm5 = vcmp.eq.f32.partialorder %v414_v48, %v3004_v23  ;;  %vm3120_vm12 = vcmp.lt.s32.totalorder %v841_v47, %v2995_v20  ;;  %vm932_vm0 = vcmp.lt.f32.partialorder %v414_v48, %v3004_v23 }
  0x9d   : > { %2582 = vmatpush3.bf16.msk.msra.mxu1 %vm2363_vm4, %v2840_v42  ;;  %vm3100_vm14 = vmand %vm1061_vm6, %vm3052_vm15  ;;  %626 = vbcast.lane.b32.xlu1 %v3077_v43, 376  ;;  %v4824_v53 = vsel %vm3120_vm12, 4294967295, %v4823_v53  ;;  %v2841_v48 = vmov 1065369472  }
  0x9e   : > { %vm3111_vm11 = vmand %vm1060_vm5, %vm3059_vm3  ;;  %622 = vbcast.lane.b32.xlu0 %v3077_v43, 368  ;;  %2583 = vmatprep.subr.bf16.mxu1 %v2837_v2  ;;  %vm3128_vm5 = vcmp.lt.s32.totalorder %v840_v49, %v2995_v20  ;;  %vm933_vm3 = vcmp.lt.f32.partialorder %v418_v46, %v3004_v23  ;;  %v4861_v46 = vmov 0 }
  0x9f   : > { %vm1332_vm13 = vmor %vm916_vm2, %vm3082_vm8  ;;  %v343_v54 = vpop.permute.xlu1 %342  ;;  %v4826_v55 = vsel %vm3128_vm5, 4294967295, %v4825_v55  ;;  %v339_v56 = vpop.permute.xlu0 %338 }
  0xa0   : > { %vm1333_vm4 = vmor %vm917_vm9, %vm3069_vm10  ;;  %vm1043_vm6 = vcmp.eq.f32.partialorder %v343_v54, %v3000_v22  ;;  %vm1042_vm2 = vcmp.eq.f32.partialorder %v339_v56, %v3000_v22 }
  0xa1   : > { %vm2349_vm8 = vmpackc.low %vm1333_vm4, %vm1332_vm13  ;;  %693 = vbcast.lane.b32.xlu1 %v3107_v51, 376 }
  0xa2   : > { %2564 = vmatpush3.bf16.msk.msra.mxu0 %vm2349_vm8, %v2840_v42  ;;  %vm3139_vm10 = vmand %vm1043_vm6, %vm3120_vm12  ;;  %689 = vbcast.lane.b32.xlu0 %v3107_v51, 368 }
  0xa3   : > { %vm3146_vm9 = vmand %vm1042_vm2, %vm3128_vm5  ;;  %v410_v59 = vpop.permute.xlu1 %409  ;;  %2565 = vmatprep.subr.bf16.mxu0 %v2837_v2  ;;  %v406_v60 = vpop.permute.xlu0 %405  ;;  %vm914_vm2 = vcmp.lt.f32.partialorder %v339_v56, %v3000_v22  ;;  %v832_v56 = vadd.s32 16, %v2925_v1 }
  0xa4   : > { %vm1348_vm13 = vmor %vm932_vm0, %vm3111_vm11  ;;  %vm1059_vm4 = vcmp.eq.f32.partialorder %v410_v59, %v3004_v23  ;;  %vm1058_vm8 = vcmp.eq.f32.partialorder %v406_v60, %v3004_v23  ;;  %vm915_vm0 = vcmp.lt.f32.partialorder %v343_v54, %v3000_v22 }
  0xa5   : > { %vm1349_vm6 = vmor %vm933_vm3, %vm3100_vm14  ;;  %618 = vbcast.lane.b32.xlu1 %v3077_v43, 360 }
  0xa6   : > { %vm2365_vm15 = vmpackc.low %vm1349_vm6, %vm1348_vm13  ;;  %614 = vbcast.lane.b32.xlu0 %v3077_v43, 352  ;;  %vm3189_vm6 = vcmp.lt.s32.totalorder %v838_v62, %v2995_v20  ;;  %v4873_v62 = vmov 0 }
  0xa7   : > { %2584 = vmatpush3.bf16.msk.msra.mxu1 %vm2365_vm15, %v2840_v42  ;;  %vm3166_vm3 = vmand %vm1059_vm4, %vm3120_vm12  ;;  %v335_v0 = vpop.permute.xlu1 %334  ;;  %v331_v6 = vpop.permute.xlu0 %330  ;;  %vm3180_vm15 = vcmp.lt.s32.totalorder %v839_v61, %v2995_v20  ;;  %v4838_v8 = vsel %vm3189_vm6, 4294967295, %v4837_v8 }
  0xa8   : > { %vm3172_vm14 = vmand %vm1058_vm8, %vm3128_vm5  ;;  %2585 = vmatprep.subr.bf16.mxu1 %v2837_v2  ;;  %v4836_v7 = vsel %vm3180_vm15, 4294967295, %v4835_v7  ;;  %vm1041_vm13 = vcmp.eq.f32.partialorder %v335_v0, %v3000_v22  ;;  %vm1040_vm8 = vcmp.eq.f32.partialorder %v331_v6, %v3000_v22  ;;  %vm931_vm5 = vcmp.lt.f32.partialorder %v410_v59, %v3004_v23 }
  0xa9   : > { %vm1330_vm11 = vmor %vm914_vm2, %vm3146_vm9  ;;  %685 = vbcast.lane.b32.xlu1 %v3107_v51, 360  ;;  %vm930_vm9 = vcmp.lt.f32.partialorder %v406_v60, %v3004_v23  ;;  %v4871_v60 = vmov 0 }
  0xaa   : > { %vm1331_vm4 = vmor %vm915_vm0, %vm3139_vm10  ;;  %681 = vbcast.lane.b32.xlu0 %v3107_v51, 352 }
  0xab   : > { %vm2351_vm2 = vmpackc.low %vm1331_vm4, %vm1330_vm11  ;;  %v402_v9 = vpop.permute.xlu1 %401  ;;  %v398_v11 = vpop.permute.xlu0 %397 }
  0xac   : > { %2566 = vmatpush3.bf16.msk.msra.mxu0 %vm2351_vm2, %v2840_v42  ;;  %vm3200_vm10 = vmand %vm1041_vm13, %vm3180_vm15  ;;  %vm1057_vm4 = vcmp.eq.f32.partialorder %v402_v9, %v3004_v23  ;;  %vm1056_vm2 = vcmp.eq.f32.partialorder %v398_v11, %v3004_v23 }
  0xad   : > { %vm3206_vm0 = vmand %vm1040_vm8, %vm3189_vm6  ;;  %2567 = vmatprep.subr.bf16.mxu0 %v2837_v2  ;;  %610 = vbcast.lane.b32.xlu1 %v3077_v43, 344  ;;  %vm912_vm8 = vcmp.lt.f32.partialorder %v331_v6, %v3000_v22 }
  0xae   : > { %vm1346_vm11 = vmor %vm930_vm9, %vm3172_vm14  ;;  %606 = vbcast.lane.b32.xlu0 %v3077_v43, 336  ;;  %vm913_vm14 = vcmp.lt.f32.partialorder %v335_v0, %v3000_v22 }
  0xaf   : > { %vm1347_vm13 = vmor %vm931_vm5, %vm3166_vm3  ;;  %v327_v14 = vpop.permute.xlu1 %326  ;;  %v323_v17 = vpop.permute.xlu0 %322  ;;  %vm3242_vm3 = vcmp.lt.s32.totalorder %v837_v13, %v2995_v20 }
  0xb0   : > { %vm2367_vm12 = vmpackc.low %vm1347_vm13, %vm1346_vm11  ;;  %v4848_v26 = vsel %vm3242_vm3, 4294967295, %v4847_v26  ;;  %vm1039_vm11 = vcmp.eq.f32.partialorder %v327_v14, %v3000_v22  ;;  %vm3250_vm13 = vcmp.lt.s32.totalorder %v836_v16, %v2995_v20  ;;  %v4883_v16 = vmov 0 }
  0xb1   : > { %2586 = vmatpush3.bf16.msk.msra.mxu1 %vm2367_vm12, %v2840_v42  ;;  %vm3226_vm9 = vmand %vm1057_vm4, %vm3180_vm15  ;;  %677 = vbcast.lane.b32.xlu1 %v3107_v51, 344  ;;  %v4850_v28 = vsel %vm3250_vm13, 4294967295, %v4849_v28 }
  0xb2   : > { %vm3233_vm5 = vmand %vm1056_vm2, %vm3189_vm6  ;;  %2587 = vmatprep.subr.bf16.mxu1 %v2837_v2  ;;  %673 = vbcast.lane.b32.xlu0 %v3107_v51, 336  ;;  %vm1038_vm2 = vcmp.eq.f32.partialorder %v323_v17, %v3000_v22  ;;  %vm929_vm6 = vcmp.lt.f32.partialorder %v402_v9, %v3004_v23 }
  0xb3   : > { %vm1328_vm12 = vmor %vm912_vm8, %vm3206_vm0  ;;  %v394_v27 = vpop.permute.xlu1 %393  ;;  %v390_v30 = vpop.permute.xlu0 %389  ;;  %vm928_vm0 = vcmp.lt.f32.partialorder %v398_v11, %v3004_v23 }
  0xb4   : > { %vm1329_vm4 = vmor %vm913_vm14, %vm3200_vm10 }
  0xb5   : > { %vm2353_vm8 = vmpackc.low %vm1329_vm4, %vm1328_vm12  ;;  %602 = vbcast.lane.b32.xlu1 %v3077_v43, 328  ;;  %vm1055_vm4 = vcmp.eq.f32.partialorder %v394_v27, %v3004_v23 }
  0xb6   : > { %2568 = vmatpush3.bf16.msk.msra.mxu0 %vm2353_vm8, %v2840_v42  ;;  %vm3261_vm10 = vmand %vm1039_vm11, %vm3242_vm3  ;;  %598 = vbcast.lane.b32.xlu0 %v3077_v43, 320  ;;  %vm1054_vm8 = vcmp.eq.f32.partialorder %v390_v30, %v3004_v23 }
  0xb7   : > { %vm3268_vm14 = vmand %vm1038_vm2, %vm3250_vm13  ;;  %2569 = vmatprep.subr.bf16.mxu0 %v2837_v2  ;;  %v319_v33 = vpop.permute.xlu1 %318  ;;  %v315_v34 = vpop.permute.xlu0 %314  ;;  %vm910_vm2 = vcmp.lt.f32.partialorder %v323_v17, %v3000_v22  ;;  %v4885_v17 = vmov 0 }
  0xb8   : > { %vm1344_vm12 = vmor %vm928_vm0, %vm3233_vm5  ;;  %vm911_vm5 = vcmp.lt.f32.partialorder %v327_v14, %v3000_v22 }
  0xb9   : > { %vm1345_vm11 = vmor %vm929_vm6, %vm3226_vm9  ;;  %669 = vbcast.lane.b32.xlu1 %v3107_v51, 328 }
  0xba   : > { %vm2369_vm15 = vmpackc.low %vm1345_vm11, %vm1344_vm12  ;;  %665 = vbcast.lane.b32.xlu0 %v3107_v51, 320  ;;  %vm1037_vm12 = vcmp.eq.f32.partialorder %v319_v33, %v3000_v22  ;;  %vm3311_vm11 = vcmp.lt.s32.totalorder %v834_v36, %v2995_v20  ;;  %v764_v36 = vsub.s32 7, %v2925_v1 }
  0xbb   : > { %2588 = vmatpush3.bf16.msk.msra.mxu1 %vm2369_vm15, %v2840_v42  ;;  %vm3288_vm6 = vmand %vm1055_vm4, %vm3242_vm3  ;;  %v386_v40 = vpop.permute.xlu1 %385  ;;  %v382_v44 = vpop.permute.xlu0 %381  ;;  %vm3302_vm15 = vcmp.lt.s32.totalorder %v835_v35, %v2995_v20  ;;  %v4862_v46 = vsel %vm3311_vm11, 4294967295, %v4861_v46  ;;  %v3519_v35 = vrot.slane %v2942_v5, %v697_v31 }
  0xbc   : > { %vm3294_vm9 = vmand %vm1054_vm8, %vm3250_vm13  ;;  %2589 = vmatprep.subr.bf16.mxu1 %v2837_v2  ;;  %v4860_v45 = vsel %vm3302_vm15, 4294967295, %v4859_v45  ;;  %vm1036_vm8 = vcmp.eq.f32.partialorder %v315_v34, %v3000_v22  ;;  %vm927_vm13 = vcmp.lt.f32.partialorder %v394_v27, %v3004_v23 }
  0xbd   : > { %vm1326_vm0 = vmor %vm910_vm2, %vm3268_vm14  ;;  %594 = vbcast.lane.b32.xlu1 %v3077_v43, 312  ;;  %vm926_vm14 = vcmp.lt.f32.partialorder %v390_v30, %v3004_v23 }
  0xbe   : > { %vm1327_vm4 = vmor %vm911_vm5, %vm3261_vm10  ;;  %590 = vbcast.lane.b32.xlu0 %v3077_v43, 304 }
  0xbf   : > { %vm2355_vm2 = vmpackc.low %vm1327_vm4, %vm1326_vm0  ;;  %v3318_v47 = vpop.permute.xlu1 %310  ;;  %v307_v49 = vpop.permute.xlu0 %306  ;;  %vm1053_vm4 = vcmp.eq.f32.partialorder %v386_v40, %v3004_v23 }
  0xc0   : > { %2570 = vmatpush3.bf16.msk.msra.mxu0 %vm2355_vm2, %v2840_v42  ;;  %vm3324_vm10 = vmand %vm1037_vm12, %vm3302_vm15  ;;  %vm1052_vm2 = vcmp.eq.f32.partialorder %v382_v44, %v3004_v23 }
  0xc1   : > { %vm3330_vm5 = vmand %vm1036_vm8, %vm3311_vm11  ;;  %2571 = vmatprep.subr.bf16.mxu0 %v2837_v2  ;;  %661 = vbcast.lane.b32.xlu1 %v3107_v51, 312  ;;  %vm908_vm8 = vcmp.lt.f32.partialorder %v315_v34, %v3000_v22 }
  0xc2   : > { %vm1342_vm0 = vmor %vm926_vm14, %vm3294_vm9  ;;  %657 = vbcast.lane.b32.xlu0 %v3107_v51, 304  ;;  %vm909_vm9 = vcmp.lt.f32.partialorder %v319_v33, %v3000_v22  ;;  %vm3370_vm14 = vcmp.lt.s32.totalorder %v833_v52, %v2995_v20 }
  0xc3   : > { %vm1343_vm12 = vmor %vm927_vm13, %vm3288_vm6  ;;  %v3344_v54 = vpop.permute.xlu1 %377  ;;  %v3348_v57 = vpop.permute.xlu0 %373  ;;  %v4872_v60 = vsel %vm3370_vm14, 4294967295, %v4871_v60 }
  0xc4   : > { %vm2371_vm3 = vmpackc.low %vm1343_vm12, %vm1342_vm0  ;;  %vm1035_vm0 = vcmp.eq.f32.partialorder %v3318_v47, %v3000_v22  ;;  %vm3381_vm12 = vcmp.lt.s32.totalorder %v832_v56, %v2995_v20 }
  0xc5   : > { %2590 = vmatpush3.bf16.msk.msra.mxu1 %vm2371_vm3, %v2840_v42  ;;  %vm3354_vm13 = vmand %vm1053_vm4, %vm3302_vm15  ;;  %586 = vbcast.lane.b32.xlu1 %v3077_v43, 296  ;;  %v4874_v62 = vsel %vm3381_vm12, 4294967295, %v4873_v62 }
  0xc6   : > { %vm3361_vm6 = vmand %vm1052_vm2, %vm3311_vm11  ;;  %2591 = vmatprep.subr.bf16.mxu1 %v2837_v2  ;;  %582 = vbcast.lane.b32.xlu0 %v3077_v43, 288  ;;  %vm924_vm2 = vcmp.lt.f32.partialorder %v382_v44, %v3004_v23  ;;  %vm925_vm11 = vcmp.lt.f32.partialorder %v386_v40, %v3004_v23  ;;  %v2774_v44 = vld [vmem:[%s2939_s6] sm:$0xff]  ;;  %s2779_s6 = sshll.u32 %s2843_s5, 4  ;;  %s2780_s6 = int_to_ptr.vmem [resolvable:$false] %s2779_s6 }
  0xc7   : > { %vm1324_vm3 = vmor %vm908_vm8, %vm3330_vm5  ;;  %v3376_v61 = vpop.permute.xlu1 %302  ;;  %vm1034_vm5 = vcmp.eq.f32.partialorder %v307_v49, %v3000_v22  ;;  %v3386_v63 = vpop.permute.xlu0 %298  ;;  %s2781_s7 = scalar_lea.vmem %s2780_s6, 256  ;;  %p2782_p0 = scmp.lt.s32.totalorder %s4692_s23, %s2780_s6 }
  0xc8   : > { %vm1325_vm4 = vmor %vm909_vm9, %vm3324_vm10  ;;  %p2783_p1 = scmp.lt.s32.totalorder %s2781_s7, %s2775_s30 }
  0xc9   : > { %vm2357_vm8 = vmpackc.low %vm1325_vm4, %vm1324_vm3  ;;  %653 = vbcast.lane.b32.xlu1 %v3107_v51, 296 }
  0xca   : > { %2572 = vmatpush3.bf16.msk.msra.mxu0 %vm2357_vm8, %v2840_v42  ;;  %vm3394_vm10 = vmand %vm1035_vm0, %vm3370_vm14  ;;  %649 = vbcast.lane.b32.xlu0 %v3107_v51, 288  ;;  %vm1051_vm0 = vcmp.eq.f32.partialorder %v3344_v54, %v3004_v23  ;;  %vm906_vm8 = vcmp.lt.f32.partialorder %v307_v49, %v3000_v22  ;;  %p2784_p2 = por %p2783_p1, %p2782_p0 }
  0xcb   : > { %vm3401_vm9 = vmand %vm1034_vm5, %vm3381_vm12  ;;  %2573 = vmatprep.subr.bf16.mxu0 %v2837_v2  ;;  %v3406_v6 = vpop.permute.xlu1 %369  ;;  %v3412_v9 = vpop.permute.xlu0 %365  ;;  %vm1050_vm5 = vcmp.eq.f32.partialorder %v3348_v57, %v3004_v23 }
  0xcc   : > { %vm1340_vm3 = vmor %vm924_vm2, %vm3361_vm6  ;;  %vm907_vm6 = vcmp.lt.f32.partialorder %v3318_v47, %v3000_v22  ;;  %vm3443_vm2 = vcmp.lt.s32.totalorder %v831_v10, %v2995_v20  ;;  %p2785_p3 = pnand %p2784_p2, %p2778_p13 }
  0xcd   : > { %vm1341_vm4 = vmor %vm925_vm11, %vm3354_vm13  ;;  %578 = vbcast.lane.b32.xlu1 %v3077_v43, 280  ;;  %v4884_v16 = vsel %vm3443_vm2, 4294967295, %v4883_v16 }
  0xce   : > { %vm2373_vm15 = vmpackc.low %vm1341_vm4, %vm1340_vm3  ;;  %574 = vbcast.lane.b32.xlu0 %v3077_v43, 272  ;;  %vm1033_vm3 = vcmp.eq.f32.partialorder %v3376_v61, %v3000_v22  ;;  %vm3454_vm4 = vcmp.lt.s32.totalorder %v2925_v1, %v2995_v20 }
  0xcf   : > { %2592 = vmatpush3.bf16.msk.msra.mxu1 %vm2373_vm15, %v2840_v42  ;;  %vm3427_vm11 = vmand %vm1051_vm0, %vm3370_vm14  ;;  %v493_v12 = vpop.permute.xlu1 %492  ;;  %v3438_v14 = vpop.permute.xlu0 %488  ;;  %v4886_v17 = vsel %vm3454_vm4, 4294967295, %v4885_v17 }
  0xd0   : > { %vm3433_vm13 = vmand %vm1050_vm5, %vm3381_vm12  ;;  %2593 = vmatprep.subr.bf16.mxu1 %v2837_v2  ;;  %vm922_vm5 = vcmp.lt.f32.partialorder %v3348_v57, %v3004_v23 }
  0xd1   : > { %vm1322_vm15 = vmor %vm906_vm8, %vm3401_vm9  ;;  %645 = vbcast.lane.b32.xlu1 %v3107_v51, 280  ;;  %vm1032_vm9 = vcmp.eq.f32.partialorder %v3386_v63, %v3000_v22 }
  0xd2   : > { %vm1323_vm0 = vmor %vm907_vm6, %vm3394_vm10  ;;  %641 = vbcast.lane.b32.xlu0 %v3107_v51, 272  ;;  %vm923_vm10 = vcmp.lt.f32.partialorder %v3344_v54, %v3004_v23 }
  0xd3   : > { %vm2359_vm8 = vmpackc.low %vm1323_vm0, %vm1322_vm15  ;;  %v3467_v24 = vpop.permute.xlu1 %559  ;;  %v3478_v27 = vpop.permute.xlu0 %555 }
  0xd4   : > { %2574 = vmatpush3.bf16.msk.msra.mxu0 %vm2359_vm8, %v2840_v42  ;;  %vm3474_vm6 = vmand %vm1033_vm3, %vm3443_vm2  ;;  %vm1049_vm3 = vcmp.eq.f32.partialorder %v3406_v6, %v3004_v23  ;;  %vm905_vm8 = vcmp.lt.f32.partialorder %v3376_v61, %v3000_v22 }
  0xd5   : > { %vm3482_vm12 = vmand %vm1032_vm9, %vm3454_vm4  ;;  %2575 = vmatprep.subr.bf16.mxu0 %v2837_v2  ;;  %570 = vbcast.lane.b32.xlu1 %v3077_v43, 264  ;;  %vm1048_vm9 = vcmp.eq.f32.partialorder %v3412_v9, %v3004_v23 }
  0xd6   : > { %vm1338_vm15 = vmor %vm922_vm5, %vm3433_vm13  ;;  %566 = vbcast.lane.b32.xlu0 %v3077_v43, 256  ;;  %vm904_vm13 = vcmp.lt.f32.partialorder %v3386_v63, %v3000_v22  ;;  %v3532_v22 = vcombine.high %v2990_v19, %v2990_v19 }
  0xd7   : > { %vm1339_vm0 = vmor %vm923_vm10, %vm3427_vm11  ;;  %v3502_v33 = vpop.permute.xlu1 %484  ;;  %v3506_v34 = vpop.permute.xlu0 %480 }
  0xd8   : > { %vm2375_vm5 = vmpackc.low %vm1339_vm0, %vm1338_vm15  ;;  %vm1079_vm15 = vcmp.eq.f32.partialorder %v493_v12, %v3496_v32  ;;  %vm951_vm0 = vcmp.lt.f32.partialorder %v493_v12, %v3496_v32  ;;  %v3558_v41 = vrot.slane %v3532_v22, %v2932_v3 }
  0xd9   : > { %2594 = vmatpush3.bf16.msk.msra.mxu1 %vm2375_vm5, %v2840_v42  ;;  %vm3513_vm14 = vmand %vm1049_vm3, %vm3443_vm2  ;;  %637 = vbcast.lane.b32.xlu1 %v3107_v51, 264  ;;  %vm1078_vm5 = vcmp.eq.f32.partialorder %v3438_v14, %v3496_v32 }
  0xda   : > { %vm3524_vm11 = vmand %vm1048_vm9, %vm3454_vm4  ;;  %2595 = vmatprep.subr.bf16.mxu1 %v2837_v2  ;;  %633 = vbcast.lane.b32.xlu0 %v3107_v51, 256  ;;  %v3548_v51 = vrot.slane %v2942_v5, %v764_v36 }
  0xdb   : > { %vm1320_vm10 = vmor %vm904_vm13, %vm3482_vm12  ;;  %v3537_v1 = vpop.permute.xlu1 %551  ;;  %v3542_v40 = vpop.permute.xlu0 %547 }
  0xdc   : > { %vm1321_vm3 = vmor %vm905_vm8, %vm3474_vm6  ;;  %vm950_vm6 = vcmp.lt.f32.partialorder %v3438_v14, %v3496_v32  ;;  %vm920_vm8 = vcmp.lt.f32.partialorder %v3412_v9, %v3004_v23 }
  0xdd   : > { %vm2361_vm9 = vmpackc.low %vm1321_vm3, %vm1320_vm10  ;;  %760 = vbcast.lane.b32.xlu1 %v3519_v35, 376 }
  0xde   : > { %2576 = vmatpush3.bf16.msk.msra.mxu0 %vm2361_vm9, %v2840_v42  ;;  %vm1239_vm12 = vmand %vm1079_vm15, %vm3024_vm7  ;;  %756 = vbcast.lane.b32.xlu0 %v3519_v35, 368  ;;  %vm921_vm15 = vcmp.lt.f32.partialorder %v3406_v6, %v3004_v23  ;;  %vm4897_vm9 = vmmov 0  }
  0xdf   : > { %vm3560_vm13 = vmor %vm951_vm0, %vm1239_vm12  ;;  %2601 = vmatprep.subr.bf16.mxu0 %v2837_v2  ;;  %v3565_v5 = vpop.permute.xlu1 %476  ;;  %v3571_v47 = vpop.permute.xlu0 %472  ;;  %vm1095_vm12 = vcmp.eq.f32.partialorder %v3467_v24, %v3558_v41 }
  0xe0   : > { %vm1238_vm10 = vmand %vm1078_vm5, %vm3010_vm1 }
  0xe1   : > { %vm1366_vm3 = vmor %vm950_vm6, %vm1238_vm10  ;;  %2578 = vmatmul.mubr.bf16.vlgmr.msra.gmra.mxu0 %v2841_v48  ;;  %827 = vbcast.lane.b32.xlu1 %v3548_v51, 376 }
  0xe2   : > { %vm2379_vm0 = vmpackc.low %vm3560_vm13, %vm1366_vm3  ;;  %823 = vbcast.lane.b32.xlu0 %v3548_v51, 368  ;;  %2617 = vmatprep.mubr.msk.bf16.mxu0 %vm4897_vm9, %v2837_v2  ;;  %vm967_vm13 = vcmp.lt.f32.partialorder %v3467_v24, %v3558_v41 }
  0xe3   : > { %vm1336_vm5 = vmor %vm920_vm8, %vm3524_vm11  ;;  %2602 = vmatpush3.bf16.msk.msra.mxu0 %vm2379_vm0, %v2840_v42  ;;  %v3587_v23 = vpop.permute.xlu1 %543  ;;  %v3594_v49 = vpop.permute.xlu0 %539  ;;  %vm1094_vm11 = vcmp.eq.f32.partialorder %v3478_v27, %v3558_v41  ;;  %vm1077_vm0 = vcmp.eq.f32.partialorder %v3502_v33, %v3496_v32 }
  0xe4   : > { %vm1337_vm6 = vmor %vm921_vm15, %vm3513_vm14  ;;  %2603 = vmatprep.subr.bf16.mxu0 %v2837_v2  ;;  %vm966_vm14 = vcmp.lt.f32.partialorder %v3478_v27, %v3558_v41 }
  0xe5   : > { %vm2377_vm10 = vmpackc.low %vm1337_vm6, %vm1336_vm5  ;;  %752 = vbcast.lane.b32.xlu1 %v3519_v35, 360 }
  0xe6   : > { %2596 = vmatpush3.bf16.msk.msra.mxu1 %vm2377_vm10, %v2840_v42  ;;  %vm1255_vm8 = vmand %vm1095_vm12, %vm3024_vm7  ;;  %748 = vbcast.lane.b32.xlu0 %v3519_v35, 352  ;;  %vm949_vm12 = vcmp.lt.f32.partialorder %v3502_v33, %v3496_v32  ;;  %vm4900_vm10 = vnez %v4812_v37 }
  0xe7   : > { %vm3605_vm15 = vmor %vm967_vm13, %vm1255_vm8  ;;  %2621 = vmatprep.subr.bf16.mxu1 %v2837_v2  ;;  %v3610_v52 = vpop.permute.xlu1 %468  ;;  %v3616_v54 = vpop.permute.xlu0 %464  ;;  %vm1076_vm13 = vcmp.eq.f32.partialorder %v3506_v34, %v3496_v32  ;;  %vm948_vm8 = vcmp.lt.f32.partialorder %v3506_v34, %v3496_v32 }
  0xe8   : > { %vm1254_vm3 = vmand %vm1094_vm11, %vm3010_vm1  ;;  %vm965_vm1 = vcmp.lt.f32.partialorder %v3537_v1, %v3558_v41 }
  0xe9   : > { %vm1382_vm5 = vmor %vm966_vm14, %vm1254_vm3  ;;  %2598 = vmatmul.mubr.bf16.vlgmr.msra.gmra.mxu1 %v2841_v48  ;;  %819 = vbcast.lane.b32.xlu1 %v3548_v51, 360 }
  0xea   : > { %vm2395_vm6 = vmpackc.low %vm3605_vm15, %vm1382_vm5  ;;  %815 = vbcast.lane.b32.xlu0 %v3548_v51, 352  ;;  %2637 = vmatprep.mubr.msk.bf16.mxu1 %vm4897_vm9, %v2837_v2  ;;  %vm4901_vm15 = vnez %v4814_v39  ;;  %vm1093_vm5 = vcmp.eq.f32.partialorder %v3537_v1, %v3558_v41 }
  0xeb   : > { %vm1237_vm11 = vmand %vm1077_vm0, %vm4900_vm10  ;;  %2622 = vmatpush3.bf16.msk.msra.mxu1 %vm2395_vm6, %v2840_v42  ;;  %v3634_v56 = vpop.permute.xlu1 %535  ;;  %v3637_v57 = vpop.permute.xlu0 %531 }
  0xec   : > { %vm1365_vm14 = vmor %vm949_vm12, %vm1237_vm11  ;;  %2623 = vmatprep.subr.bf16.mxu1 %v2837_v2  ;;  %vm1092_vm12 = vcmp.eq.f32.partialorder %v3542_v40, %v3558_v41  ;;  %vm964_vm11 = vcmp.lt.f32.partialorder %v3542_v40, %v3558_v41  ;;  %v233_v40 = vld [vmem:[%s227_s9] sm:$0xff] }
  0xed   : > { %vm1236_vm3 = vmand %vm1076_vm13, %vm4901_vm15  ;;  %744 = vbcast.lane.b32.xlu1 %v3519_v35, 344 }
  0xee   : > { %vm1364_vm0 = vmor %vm948_vm8, %vm1236_vm3  ;;  %740 = vbcast.lane.b32.xlu0 %v3519_v35, 336  ;;  %vm1075_vm3 = vcmp.eq.f32.partialorder %v3565_v5, %v3496_v32 }
  0xef   : > { %vm2381_vm6 = vmpackc.low %vm1365_vm14, %vm1364_vm0  ;;  %v3649_v58 = vpop.permute.xlu1 %460  ;;  %v3656_v59 = vpop.permute.xlu0 %456  ;;  %vm947_vm0 = vcmp.lt.f32.partialorder %v3565_v5, %v3496_v32  ;;  %v236_v5 = vcombine.high %v2774_v44, %v2774_v44 }
  0xf0   : > { %vm1253_vm13 = vmand %vm1093_vm5, %vm4900_vm10  ;;  %2604 = vmatpush3.bf16.msk.msra.mxu0 %vm2381_vm6, %v2840_v42  ;;  %vm963_vm10 = vcmp.lt.f32.partialorder %v3587_v23, %v3558_v41 }
  0xf1   : > { %vm1381_vm8 = vmor %vm965_vm1, %vm1253_vm13  ;;  %2605 = vmatprep.subr.bf16.mxu0 %v2837_v2  ;;  %811 = vbcast.lane.b32.xlu1 %v3548_v51, 344  ;;  %vm1074_vm1 = vcmp.eq.f32.partialorder %v3571_v47, %v3496_v32  ;;  %vm4902_vm13 = vnez %v4824_v53 }
  0xf2   : > { %vm1252_vm14 = vmand %vm1092_vm12, %vm4901_vm15  ;;  %807 = vbcast.lane.b32.xlu0 %v3548_v51, 336  ;;  %vm946_vm15 = vcmp.lt.f32.partialorder %v3571_v47, %v3496_v32  ;;  %v2098_v47 = vstv %s3933_s13 }
  0xf3   : > { %vm1380_vm5 = vmor %vm964_vm11, %vm1252_vm14  ;;  %v3667_v61 = vpop.permute.xlu1 %527  ;;  %v3671_v63 = vpop.permute.xlu0 %523 }
  0xf4   : > { %vm2397_vm6 = vmpackc.low %vm1381_vm8, %vm1380_vm5  ;;  %vm4903_vm8 = vnez %v4826_v55  ;;  %vm1091_vm5 = vcmp.eq.f32.partialorder %v3587_v23, %v3558_v41 }
  0xf5   : > { %vm1235_vm12 = vmand %vm1075_vm3, %vm4902_vm13  ;;  %2624 = vmatpush3.bf16.msk.msra.mxu1 %vm2397_vm6, %v2840_v42  ;;  %736 = vbcast.lane.b32.xlu1 %v3519_v35, 328 }
  0xf6   : > { %vm1363_vm11 = vmor %vm947_vm0, %vm1235_vm12  ;;  %2625 = vmatprep.subr.bf16.mxu1 %v2837_v2  ;;  %732 = vbcast.lane.b32.xlu0 %v3519_v35, 320  ;;  %vm1090_vm0 = vcmp.eq.f32.partialorder %v3594_v49, %v3558_v41  ;;  %vm962_vm12 = vcmp.lt.f32.partialorder %v3594_v49, %v3558_v41 }
  0xf7   : > { %vm1234_vm14 = vmand %vm1074_vm1, %vm4903_vm8  ;;  %v3685_v0 = vpop.permute.xlu1 %452  ;;  %v3689_v4 = vpop.permute.xlu0 %448 }
  0xf8   : > { %vm1362_vm3 = vmor %vm946_vm15, %vm1234_vm14  ;;  %vm1073_vm14 = vcmp.eq.f32.partialorder %v3610_v52, %v3496_v32 }
  0xf9   : > { %vm2383_vm6 = vmpackc.low %vm1363_vm11, %vm1362_vm3  ;;  %803 = vbcast.lane.b32.xlu1 %v3548_v51, 328  ;;  %vm945_vm3 = vcmp.lt.f32.partialorder %v3610_v52, %v3496_v32  ;;  %v232_v52 = vld [vmem:[%s223_s12] sm:$0xff] }
  0xfa   : > { %vm1251_vm1 = vmand %vm1091_vm5, %vm4902_vm13  ;;  %2606 = vmatpush3.bf16.msk.msra.mxu0 %vm2383_vm6, %v2840_v42  ;;  %799 = vbcast.lane.b32.xlu0 %v3548_v51, 320  ;;  %vm961_vm13 = vcmp.lt.f32.partialorder %v3634_v56, %v3558_v41  ;;  %2772 = vrcp.f32 %v232_v52 }
  0xfb   : > { %vm1379_vm15 = vmor %vm963_vm10, %vm1251_vm1  ;;  %2607 = vmatprep.subr.bf16.mxu0 %v2837_v2  ;;  %v3701_v6 = vpop.permute.xlu1 %519  ;;  %v3707_v9 = vpop.permute.xlu0 %515  ;;  %vm1072_vm10 = vcmp.eq.f32.partialorder %v3616_v54, %v3496_v32  ;;  %vm4904_vm1 = vnez %v4836_v7 }
  0xfc   : > { %vm1250_vm11 = vmand %vm1090_vm0, %vm4903_vm8  ;;  %vm944_vm8 = vcmp.lt.f32.partialorder %v3616_v54, %v3496_v32 }
  0xfd   : > { %vm1378_vm5 = vmor %vm962_vm12, %vm1250_vm11  ;;  %728 = vbcast.lane.b32.xlu1 %v3519_v35, 312 }
  0xfe   : > { %vm2399_vm6 = vmpackc.low %vm1379_vm15, %vm1378_vm5  ;;  %724 = vbcast.lane.b32.xlu0 %v3519_v35, 304  ;;  %vm4905_vm15 = vnez %v4838_v8  ;;  %vm1089_vm5 = vcmp.eq.f32.partialorder %v3634_v56, %v3558_v41  ;;  %v250_v56 = vrot.slane %v236_v5, %v2976_v15 }
  0xff   : > { %vm1233_vm0 = vmand %vm1073_vm14, %vm4904_vm1  ;;  %2626 = vmatpush3.bf16.msk.msra.mxu1 %vm2399_vm6, %v2840_v42  ;;  %v3720_v10 = vpop.permute.xlu1 %444  ;;  %v3723_v11 = vpop.permute.xlu0 %440 }
 0x100   : > { %vm1361_vm12 = vmor %vm945_vm3, %vm1233_vm0  ;;  %2627 = vmatprep.subr.bf16.mxu1 %v2837_v2  ;;  %vm1088_vm3 = vcmp.eq.f32.partialorder %v3637_v57, %v3558_v41  ;;  %vm960_vm0 = vcmp.lt.f32.partialorder %v3637_v57, %v3558_v41  ;;  %v2842_v57 = vmov 0  }
 0x101   : > { %vm1232_vm11 = vmand %vm1072_vm10, %vm4905_vm15  ;;  %795 = vbcast.lane.b32.xlu1 %v3548_v51, 312  ;;  %2768 = vset.pattern.permute.xlu0 %v2842_v57 }
 0x102   : > { %vm1360_vm14 = vmor %vm944_vm8, %vm1232_vm11  ;;  %791 = vbcast.lane.b32.xlu0 %v3548_v51, 304  ;;  %vm1071_vm11 = vcmp.eq.f32.partialorder %v3649_v58, %v3496_v32  ;;  %2769 = vset.pattern.permute.xlu1 %v2842_v57 }
 0x103   : > { %vm2385_vm6 = vmpackc.low %vm1361_vm12, %vm1360_vm14  ;;  %v3735_v12 = vpop.permute.xlu1 %511  ;;  %v3742_v13 = vpop.permute.xlu0 %507  ;;  %vm943_vm14 = vcmp.lt.f32.partialorder %v3649_v58, %v3496_v32 }
 0x104   : > { %vm1249_vm10 = vmand %vm1089_vm5, %vm4904_vm1  ;;  %2608 = vmatpush3.bf16.msk.msra.mxu0 %vm2385_vm6, %v2840_v42  ;;  %vm959_vm1 = vcmp.lt.f32.partialorder %v3667_v61, %v3558_v41 }
 0x105   : > { %vm1377_vm8 = vmor %vm961_vm13, %vm1249_vm10  ;;  %2609 = vmatprep.subr.bf16.mxu0 %v2837_v2  ;;  %720 = vbcast.lane.b32.xlu1 %v3519_v35, 296  ;;  %vm1070_vm13 = vcmp.eq.f32.partialorder %v3656_v59, %v3496_v32  ;;  %vm4906_vm10 = vnez %v4848_v26 }
 0x106   : > { %vm1248_vm12 = vmand %vm1088_vm3, %vm4905_vm15  ;;  %716 = vbcast.lane.b32.xlu0 %v3519_v35, 288  ;;  %vm942_vm15 = vcmp.lt.f32.partialorder %v3656_v59, %v3496_v32 }
 0x107   : > { %vm1376_vm5 = vmor %vm960_vm0, %vm1248_vm12  ;;  %v3753_v14 = vpop.permute.xlu1 %436  ;;  %v3757_v24 = vpop.permute.xlu0 %432 }
 0x108   : > { %vm2401_vm6 = vmpackc.low %vm1377_vm8, %vm1376_vm5  ;;  %vm4907_vm8 = vnez %v4850_v28  ;;  %vm1087_vm5 = vcmp.eq.f32.partialorder %v3667_v61, %v3558_v41 }
 0x109   : > { %vm1231_vm3 = vmand %vm1071_vm11, %vm4906_vm10  ;;  %2628 = vmatpush3.bf16.msk.msra.mxu1 %vm2401_vm6, %v2840_v42  ;;  %787 = vbcast.lane.b32.xlu1 %v3548_v51, 296 }
 0x10a   : > { %vm1359_vm0 = vmor %vm943_vm14, %vm1231_vm3  ;;  %2629 = vmatprep.subr.bf16.mxu1 %v2837_v2  ;;  %783 = vbcast.lane.b32.xlu0 %v3548_v51, 288  ;;  %vm1086_vm14 = vcmp.eq.f32.partialorder %v3671_v63, %v3558_v41  ;;  %vm958_vm3 = vcmp.lt.f32.partialorder %v3671_v63, %v3558_v41 }
 0x10b   : > { %vm1230_vm12 = vmand %vm1070_vm13, %vm4907_vm8  ;;  %v3771_v20 = vpop.permute.xlu1 %503 }
 0x10c   : > { %vm1358_vm11 = vmor %vm942_vm15, %vm1230_vm12  ;;  %v3775_v27 = vpop.permute.xlu0 %499  ;;  %vm1069_vm12 = vcmp.eq.f32.partialorder %v3685_v0, %v3496_v32 }
 0x10d   : > { %vm2387_vm6 = vmpackc.low %vm1359_vm0, %vm1358_vm11  ;;  %712 = vbcast.lane.b32.xlu1 %v3519_v35, 280  ;;  %vm941_vm11 = vcmp.lt.f32.partialorder %v3685_v0, %v3496_v32  ;;  %v1961_v0 = vcombine.high %v233_v40, %v233_v40 }
 0x10e   : > { %vm1247_vm13 = vmand %vm1087_vm5, %vm4906_vm10  ;;  %2610 = vmatpush3.bf16.msk.msra.mxu0 %vm2387_vm6, %v2840_v42  ;;  %708 = vbcast.lane.b32.xlu0 %v3519_v35, 272  ;;  %vm957_vm10 = vcmp.lt.f32.partialorder %v3701_v6, %v3558_v41 }
 0x10f   : > { %vm1375_vm15 = vmor %vm959_vm1, %vm1247_vm13  ;;  %2611 = vmatprep.subr.bf16.mxu0 %v2837_v2  ;;  %v3787_v30 = vpop.permute.xlu1 %626  ;;  %vm1068_vm1 = vcmp.eq.f32.partialorder %v3689_v4, %v3496_v32  ;;  %vm4908_vm13 = vnez %v4860_v45 }
 0x110   : > { %vm1246_vm0 = vmand %vm1086_vm14, %vm4907_vm8  ;;  %v3793_v31 = vpop.permute.xlu0 %622  ;;  %vm940_vm8 = vcmp.lt.f32.partialorder %v3689_v4, %v3496_v32  ;;  %v3912_v4 = vrot.slane %v250_v56, %v2976_v15 }
 0x111   : > { %vm1374_vm5 = vmor %vm958_vm3, %vm1246_vm0  ;;  %779 = vbcast.lane.b32.xlu1 %v3548_v51, 280 }
 0x112   : > { %vm2403_vm6 = vmpackc.low %vm1375_vm15, %vm1374_vm5  ;;  %775 = vbcast.lane.b32.xlu0 %v3548_v51, 272  ;;  %vm4909_vm15 = vnez %v4862_v46  ;;  %vm1085_vm5 = vcmp.eq.f32.partialorder %v3701_v6, %v3558_v41 }
 0x113   : > { %vm1229_vm14 = vmand %vm1069_vm12, %vm4908_vm13  ;;  %2630 = vmatpush3.bf16.msk.msra.mxu1 %vm2403_vm6, %v2840_v42  ;;  %v3806_v33 = vpop.permute.xlu1 %693 }
 0x114   : > { %vm1357_vm3 = vmor %vm941_vm11, %vm1229_vm14  ;;  %2631 = vmatprep.subr.bf16.mxu1 %v2837_v2  ;;  %v3809_v34 = vpop.permute.xlu0 %689  ;;  %vm1084_vm11 = vcmp.eq.f32.partialorder %v3707_v9, %v3558_v41  ;;  %vm956_vm14 = vcmp.lt.f32.partialorder %v3707_v9, %v3558_v41 }
 0x115   : > { %vm1228_vm0 = vmand %vm1068_vm1, %vm4909_vm15  ;;  %704 = vbcast.lane.b32.xlu1 %v3519_v35, 264 }
 0x116   : > { %vm1356_vm12 = vmor %vm940_vm8, %vm1228_vm0  ;;  %700 = vbcast.lane.b32.xlu0 %v3519_v35, 256  ;;  %vm1067_vm0 = vcmp.eq.f32.partialorder %v3720_v10, %v3496_v32 }
 0x117   : > { %vm2389_vm6 = vmpackc.low %vm1357_vm3, %vm1356_vm12  ;;  %v3821_v43 = vpop.permute.xlu1 %618 }
 0x118   : > { %vm1245_vm1 = vmand %vm1085_vm5, %vm4908_vm13  ;;  %2612 = vmatpush3.bf16.msk.msra.mxu0 %vm2389_vm6, %v2840_v42  ;;  %v3828_v36 = vpop.permute.xlu0 %614  ;;  %vm1066_vm6 = vcmp.eq.f32.partialorder %v3723_v11, %v3496_v32 }
 0x119   : > { %vm3830_vm8 = vmor %vm957_vm10, %vm1245_vm1  ;;  %2613 = vmatprep.subr.bf16.mxu0 %v2837_v2  ;;  %771 = vbcast.lane.b32.xlu1 %v3548_v51, 264  ;;  %vm939_vm10 = vcmp.lt.f32.partialorder %v3720_v10, %v3496_v32  ;;  %v252_v10 = vcombine.high %v250_v56, %v250_v56 }
 0x11a   : > { %vm1244_vm3 = vmand %vm1084_vm11, %vm4909_vm15  ;;  %767 = vbcast.lane.b32.xlu0 %v3548_v51, 256  ;;  %vm4912_vm11 = vnez %v4872_v60  ;;  %v1968_v51 = vrot.slane %v233_v40, %v2976_v15 }
 0x11b   : > { %vm1372_vm5 = vmor %vm956_vm14, %vm1244_vm3  ;;  %v3843_v35 = vpop.permute.xlu1 %685  ;;  %vm938_vm14 = vcmp.lt.f32.partialorder %v3723_v11, %v3496_v32  ;;  %vm4915_vm3 = vnez %v4874_v62  ;;  %v3946_v38 = vrot.slane %v252_v10, %v2976_v15 }
 0x11c   : > { %vm2405_vm12 = vmpackc.low %vm3830_vm8, %vm1372_vm5  ;;  %v3853_v1 = vpop.permute.xlu0 %681  ;;  %v1976_v49 = vcombine.high %v1968_v51, %v1968_v51  ;;  %v1984_v58 = vrot.slane %v1968_v51, %v2976_v15 }
 0x11d   : > { %vm1227_vm1 = vmand %vm1067_vm0, %vm4912_vm11  ;;  %2632 = vmatpush3.bf16.msk.msra.mxu1 %vm2405_vm12, %v2840_v42  ;;  %vm1083_vm0 = vcmp.eq.f32.partialorder %v3735_v12, %v3558_v41 }
 0x11e   : > { %vm3862_vm8 = vmor %vm939_vm10, %vm1227_vm1  ;;  %2633 = vmatprep.subr.bf16.mxu1 %v2837_v2  ;;  %vm955_vm10 = vcmp.lt.f32.partialorder %v3735_v12, %v3558_v41  ;;  %vm1082_vm1 = vcmp.eq.f32.partialorder %v3742_v13, %v3558_v41  ;;  %v1998_v54 = vrot.slane %v1976_v49, %v2976_v15  ;;  %2011 = vperm.xlu0 %2768, %v1984_v58  }
 0x11f   : > { %vm1226_vm5 = vmand %vm1066_vm6, %vm4915_vm3  ;;  %v3871_v23 = vpop.permute.xlu1 %610  ;;  %v2006_v6 = vcombine.high %v1984_v58, %v1984_v58  ;;  %v1975_v12 = vrot.slane %v1961_v0, %v2976_v15 }
 0x120   : > { %vm1354_vm12 = vmor %vm938_vm14, %vm1226_vm5  ;;  %v3879_v50 = vpop.permute.xlu0 %606  ;;  %vm954_vm14 = vcmp.lt.f32.partialorder %v3742_v13, %v3558_v41  ;;  %2019 = vperm.xlu1 %2769, %v1998_v54   ;;  %v2008_v9 = vcombine.high %v1998_v54, %v1998_v54 }
 0x121   : > { %vm2391_vm6 = vmpackc.low %vm3862_vm8, %vm1354_vm12  ;;  %vm937_vm12 = vcmp.lt.f32.partialorder %v3753_v14, %v3496_v32  ;;  %v1991_v51 = vrot.slane %v1975_v12, %v2976_v15 }
 0x122   : > { %vm1243_vm15 = vmand %vm1083_vm0, %vm4912_vm11  ;;  %2614 = vmatpush3.bf16.msk.msra.mxu0 %vm2391_vm6, %v2840_v42  ;;  %vm1065_vm0 = vcmp.eq.f32.partialorder %v3753_v14, %v3496_v32  ;;  %vm1064_vm6 = vcmp.eq.f32.partialorder %v3757_v24, %v3496_v32  ;;  %2035 = vperm.xlu0 %2768, %v2008_v9  }
 0x123   : > { %vm3893_vm8 = vmor %vm955_vm10, %vm1243_vm15  ;;  %2615 = vmatprep.subr.bf16.mxu0 %v2837_v2  ;;  %v3898_v61 = vpop.permute.xlu1 %677  ;;  %v2007_v54 = vcombine.high %v1991_v51, %v1991_v51 }
 0x124   : > { %vm1242_vm5 = vmand %vm1082_vm1, %vm4915_vm3  ;;  %v3904_v63 = vpop.permute.xlu0 %673  ;;  %2027 = vperm.xlu1 %2769, %v2006_v6  }
 0x125   : > { %vm1370_vm15 = vmor %vm954_vm14, %vm1242_vm5  ;;  %vm936_vm14 = vcmp.lt.f32.partialorder %v3757_v24, %v3496_v32  ;;  %v1977_v32 = vcombine.high %v1975_v12, %v1975_v12  ;;  %v3941_v24 = vrot.slane %v3912_v4, %v2932_v3 }
 0x126   : > { %vm2407_vm10 = vmpackc.low %vm3893_vm8, %vm1370_vm15 }
 0x127   : > { %vm1225_vm1 = vmand %vm1065_vm0, %vm3443_vm2  ;;  %2634 = vmatpush3.bf16.msk.msra.mxu1 %vm2407_vm10, %v2840_v42  ;;  %v3923_v11 = vpop.permute.xlu1 %602  ;;  %vm1081_vm0 = vcmp.eq.f32.partialorder %v3771_v20, %v3558_v41  ;;  %v2005_v44 = vrot.slane %v1977_v32, %v2976_v15 }
 0x128   : > { %vm3926_vm5 = vmor %vm937_vm12, %vm1225_vm1  ;;  %2635 = vmatprep.subr.bf16.mxu1 %v2837_v2  ;;  %v3931_v14 = vpop.permute.xlu0 %598  ;;  %vm953_vm12 = vcmp.lt.f32.partialorder %v3771_v20, %v3558_v41  ;;  %2043 = vperm.xlu1 %2769, %v1991_v51  }
 0x129   : > { %vm1224_vm8 = vmand %vm1064_vm6, %vm3454_vm4  ;;  %vm1080_vm6 = vcmp.eq.f32.partialorder %v3775_v27, %v3558_v41  ;;  %2051 = vperm.xlu0 %2768, %v2005_v44   ;;  %v2009_v56 = vcombine.high %v2005_v44, %v2005_v44 }
 0x12a   : > { %vm1352_vm15 = vmor %vm936_vm14, %vm1224_vm8  ;;  %vm952_vm14 = vcmp.lt.f32.partialorder %v3775_v27, %v3558_v41  ;;  %v2773_v41 = vpop.eup %2772  ;;  %v3975_v27 = vrot.slane %v3946_v38, %v2932_v3 }
 0x12b   : > { %vm2393_vm10 = vmpackc.low %vm3926_vm5, %vm1352_vm15  ;;  %v3952_v40 = vpop.permute.xlu1 %669  ;;  %v3998_v57 = vmul.f32 %v2773_v41, %v2098_v47 }
 0x12c   : > { %vm1241_vm1 = vmand %vm1081_vm0, %vm3443_vm2  ;;  %2616 = vmatpush3.bf16.msk.msra.mxu0 %vm2393_vm10, %v2840_v42  ;;  %v3961_v20 = vpop.permute.xlu0 %665  ;;  %vm1111_vm0 = vcmp.eq.f32.partialorder %v3787_v30, %v3941_v24  ;;  %2059 = vperm.xlu1 %2769, %v2007_v54  }
 0x12d   : > { %vm3963_vm5 = vmor %vm953_vm12, %vm1241_vm1  ;;  %2641 = vmatprep.subr.bf16.mxu0 %v2837_v2  ;;  %vm983_vm12 = vcmp.lt.f32.partialorder %v3787_v30, %v3941_v24  ;;  %2067 = vperm.xlu0 %2768, %v2009_v56   ;;  %v2102_v47 = vcombine.high %v3998_v57, %v3998_v57 }
 0x12e   : > { %vm1240_vm8 = vmand %vm1080_vm6, %vm3454_vm4  ;;  %vm1110_vm6 = vcmp.eq.f32.partialorder %v3793_v31, %v3941_v24 }
 0x12f   : > { %vm1368_vm15 = vmor %vm952_vm14, %vm1240_vm8  ;;  %2618 = vmatmul.mubr.bf16.vlgmr.msra.gmra.mxu0 %v2841_v48  ;;  %v3980_v49 = vpop.permute.xlu1 %594  ;;  %vm982_vm14 = vcmp.lt.f32.partialorder %v3793_v31, %v3941_v24  ;;  %vm4924_vm8 = vnez %v4802_v25  ;;  %v2109_v31 = vrot.slane %v3998_v57, %v2976_v15  ;;  %v2116_v41 = vrot.slane %v2102_v47, %v2976_v15 }
 0x130   : > { %vm2409_vm10 = vmpackc.low %vm3963_vm5, %vm1368_vm15  ;;  %v3986_v52 = vpop.permute.xlu0 %590  ;;  %2657 = vmatprep.mubr.msk.bf16.mxu0 %vm4897_vm9, %v2837_v2 }
 0x131   : > { %vm1271_vm1 = vmand %vm1111_vm0, %vm3024_vm7  ;;  %2636 = vmatpush3.bf16.msk.msra.mxu1 %vm2409_vm10, %v2840_v42  ;;  %vm1127_vm0 = vcmp.eq.f32.partialorder %v3806_v33, %v3975_v27  ;;  %v4025_v0 = vrot.slane %v2109_v31, %v2976_v15  ;;  %v2117_v6 = vcombine.high %v2109_v31, %v2109_v31  ;;  %v2118_v56 = vcombine.high %v2116_v41, %v2116_v41 }
 0x132   : > { %vm4000_vm5 = vmor %vm983_vm12, %vm1271_vm1  ;;  %2661 = vmatprep.subr.bf16.mxu1 %v2837_v2  ;;  %vm999_vm12 = vcmp.lt.f32.partialorder %v3806_v33, %v3975_v27  ;;  %vm1126_vm1 = vcmp.eq.f32.partialorder %v3809_v34, %v3975_v27 }
 0x133   : > { %vm1270_vm15 = vmand %vm1110_vm6, %vm4924_vm8  ;;  %v4009_v30 = vpop.permute.xlu1 %661  ;;  %2160 = vperm.xlu1 %2769, %v4025_v0   ;;  %v4041_v10 = vrot.slane %v2117_v6, %v2976_v15  ;;  %v2147_v44 = vcombine.high %v4025_v0, %v4025_v0 }
 0x134   : > { %vm1398_vm10 = vmor %vm982_vm14, %vm1270_vm15  ;;  %2638 = vmatmul.mubr.bf16.vlgmr.msra.gmra.mxu1 %v2841_v48  ;;  %v4016_v59 = vpop.permute.xlu0 %657  ;;  %vm998_vm15 = vcmp.lt.f32.partialorder %v3809_v34, %v3975_v27 }
 0x135   : > { %vm2411_vm6 = vmpackc.low %vm4000_vm5, %vm1398_vm10  ;;  %2677 = vmatprep.mubr.msk.bf16.mxu1 %vm4897_vm9, %v2837_v2  ;;  %2168 = vperm.xlu0 %2768, %v4041_v10  }
 0x136   : > { %vm1287_vm14 = vmand %vm1127_vm0, %vm3024_vm7  ;;  %2642 = vmatpush3.bf16.msk.msra.mxu0 %vm2411_vm6, %v2840_v42  ;;  %vm1109_vm0 = vcmp.eq.f32.partialorder %v3821_v43, %v3941_v24  ;;  %vm4927_vm7 = vnez %v4812_v37 }
 0x137   : > { %vm4032_vm4 = vmor %vm999_vm12, %vm1287_vm14  ;;  %2643 = vmatprep.subr.bf16.mxu0 %v2837_v2  ;;  %v4037_v9 = vpop.permute.xlu1 %586  ;;  %vm981_vm12 = vcmp.lt.f32.partialorder %v3821_v43, %v3941_v24  ;;  %vm1108_vm14 = vcmp.eq.f32.partialorder %v3828_v36, %v3941_v24  ;;  %2176 = vperm.xlu1 %2769, %v2147_v44  }
 0x138   : > { %vm1286_vm5 = vmand %vm1126_vm1, %vm4924_vm8  ;;  %v4047_v34 = vpop.permute.xlu0 %582  ;;  %vm980_vm8 = vcmp.lt.f32.partialorder %v3828_v36, %v3941_v24 }
 0x139   : > { %vm1414_vm10 = vmor %vm998_vm15, %vm1286_vm5 }
 0x13a   : > { %vm2427_vm6 = vmpackc.low %vm4032_vm4, %vm1414_vm10  ;;  %vm4928_vm4 = vnez %v4814_v39  ;;  %vm1125_vm10 = vcmp.eq.f32.partialorder %v3843_v35, %v3975_v27 }
 0x13b   : > { %vm1269_vm1 = vmand %vm1109_vm0, %vm4927_vm7  ;;  %2662 = vmatpush3.bf16.msk.msra.mxu1 %vm2427_vm6, %v2840_v42  ;;  %v4061_v12 = vpop.permute.xlu1 %653  ;;  %vm997_vm0 = vcmp.lt.f32.partialorder %v3843_v35, %v3975_v27  ;;  %vm1124_vm6 = vcmp.eq.f32.partialorder %v3853_v1, %v3975_v27 }
 0x13c   : > { %vm1397_vm15 = vmor %vm981_vm12, %vm1269_vm1  ;;  %2663 = vmatprep.subr.bf16.mxu1 %v2837_v2  ;;  %v4064_v43 = vpop.permute.xlu0 %649  ;;  %vm996_vm1 = vcmp.lt.f32.partialorder %v3853_v1, %v3975_v27 }
 0x13d   : > { %vm1268_vm5 = vmand %vm1108_vm14, %vm4928_vm4  ;;  %vm1107_vm14 = vcmp.eq.f32.partialorder %v3871_v23, %v3941_v24 }
 0x13e   : > { %vm1396_vm9 = vmor %vm980_vm8, %vm1268_vm5  ;;  %vm979_vm5 = vcmp.lt.f32.partialorder %v3871_v23, %v3941_v24 }
 0x13f   : > { %vm2413_vm2 = vmpackc.low %vm1397_vm15, %vm1396_vm9  ;;  %v4074_v36 = vpop.permute.xlu1 %578 }
 0x140   : > { %vm1285_vm12 = vmand %vm1125_vm10, %vm4927_vm7  ;;  %2644 = vmatpush3.bf16.msk.msra.mxu0 %vm2413_vm2, %v2840_v42  ;;  %v4081_v13 = vpop.permute.xlu0 %574  ;;  %vm1106_vm2 = vcmp.eq.f32.partialorder %v3879_v50, %v3941_v24 }
 0x141   : > { %vm1413_vm8 = vmor %vm997_vm0, %vm1285_vm12  ;;  %2645 = vmatprep.subr.bf16.mxu0 %v2837_v2  ;;  %vm4929_vm0 = vnez %v4824_v53 }
 0x142   : > { %vm1284_vm9 = vmand %vm1124_vm6, %vm4928_vm4  ;;  %vm978_vm6 = vcmp.lt.f32.partialorder %v3879_v50, %v3941_v24 }
 0x143   : > { %vm1412_vm15 = vmor %vm996_vm1, %vm1284_vm9  ;;  %v4090_v35 = vpop.permute.xlu1 %645  ;;  %vm4930_vm9 = vnez %v4826_v55 }
 0x144   : > { %vm2429_vm10 = vmpackc.low %vm1413_vm8, %vm1412_vm15  ;;  %v4094_v1 = vpop.permute.xlu0 %641  ;;  %vm1123_vm8 = vcmp.eq.f32.partialorder %v3898_v61, %v3975_v27 }
 0x145   : > { %vm1267_vm12 = vmand %vm1107_vm14, %vm4929_vm0  ;;  %2664 = vmatpush3.bf16.msk.msra.mxu1 %vm2429_vm10, %v2840_v42  ;;  %vm995_vm14 = vcmp.lt.f32.partialorder %v3898_v61, %v3975_v27 }
 0x146   : > { %vm1395_vm1 = vmor %vm979_vm5, %vm1267_vm12  ;;  %2665 = vmatprep.subr.bf16.mxu1 %v2837_v2  ;;  %vm1122_vm5 = vcmp.eq.f32.partialorder %v3904_v63, %v3975_v27 }
 0x147   : > { %vm1266_vm4 = vmand %vm1106_vm2, %vm4930_vm9  ;;  %v4106_v23 = vpop.permute.xlu1 %570  ;;  %vm994_vm2 = vcmp.lt.f32.partialorder %v3904_v63, %v3975_v27 }
 0x148   : > { %vm1394_vm15 = vmor %vm978_vm6, %vm1266_vm4  ;;  %v4110_v32 = vpop.permute.xlu0 %566  ;;  %vm1105_vm6 = vcmp.eq.f32.partialorder %v3923_v11, %v3941_v24 }
 0x149   : > { %vm2415_vm7 = vmpackc.low %vm1395_vm1, %vm1394_vm15 }
 0x14a   : > { %vm1283_vm10 = vmand %vm1123_vm8, %vm4929_vm0  ;;  %2646 = vmatpush3.bf16.msk.msra.mxu0 %vm2415_vm7, %v2840_v42  ;;  %vm977_vm8 = vcmp.lt.f32.partialorder %v3923_v11, %v3941_v24  ;;  %vm1104_vm7 = vcmp.eq.f32.partialorder %v3931_v14, %v3941_v24  ;;  %vm976_vm0 = vcmp.lt.f32.partialorder %v3931_v14, %v3941_v24 }
 0x14b   : > { %vm1411_vm12 = vmor %vm995_vm14, %vm1283_vm10  ;;  %2647 = vmatprep.subr.bf16.mxu0 %v2837_v2  ;;  %v4120_v50 = vpop.permute.xlu1 %637  ;;  %vm4931_vm14 = vnez %v4836_v7 }
 0x14c   : > { %vm1282_vm4 = vmand %vm1122_vm5, %vm4930_vm9  ;;  %v4126_v61 = vpop.permute.xlu0 %633 }
 0x14d   : > { %vm1410_vm1 = vmor %vm994_vm2, %vm1282_vm4  ;;  %vm4932_vm2 = vnez %v4838_v8  ;;  %vm1121_vm4 = vcmp.eq.f32.partialorder %v3952_v40, %v3975_v27 }
 0x14e   : > { %vm2431_vm15 = vmpackc.low %vm1411_vm12, %vm1410_vm1 }
 0x14f   : > { %vm1265_vm10 = vmand %vm1105_vm6, %vm4931_vm14  ;;  %2666 = vmatpush3.bf16.msk.msra.mxu1 %vm2431_vm15, %v2840_v42  ;;  %v4137_v63 = vpop.permute.xlu1 %760  ;;  %vm993_vm6 = vcmp.lt.f32.partialorder %v3952_v40, %v3975_v27  ;;  %vm1120_vm15 = vcmp.eq.f32.partialorder %v3961_v20, %v3975_v27  ;;  %v2149_v40 = vcombine.high %v4041_v10, %v4041_v10 }
 0x150   : > { %vm1393_vm5 = vmor %vm977_vm8, %vm1265_vm10  ;;  %2667 = vmatprep.subr.bf16.mxu1 %v2837_v2  ;;  %v4140_v51 = vpop.permute.xlu0 %756  ;;  %vm992_vm10 = vcmp.lt.f32.partialorder %v3961_v20, %v3975_v27 }
 0x151   : > { %vm1264_vm12 = vmand %vm1104_vm7, %vm4932_vm2  ;;  %vm1103_vm7 = vcmp.eq.f32.partialorder %v3980_v49, %v3941_v24  ;;  %2184 = vperm.xlu0 %2768, %v2149_v40  }
 0x152   : > { %vm1392_vm1 = vmor %vm976_vm0, %vm1264_vm12  ;;  %vm975_vm12 = vcmp.lt.f32.partialorder %v3980_v49, %v3941_v24  ;;  %v2132_v49 = vrot.slane %v2116_v41, %v2976_v15 }
 0x153   : > { %vm2417_vm9 = vmpackc.low %vm1393_vm5, %vm1392_vm1  ;;  %v4150_v11 = vpop.permute.xlu1 %827  ;;  %vm1102_vm1 = vcmp.eq.f32.partialorder %v3986_v52, %v3941_v24 }
 0x154   : > { %vm1281_vm8 = vmand %vm1121_vm4, %vm4931_vm14  ;;  %2648 = vmatpush3.bf16.msk.msra.mxu0 %vm2417_vm9, %v2840_v42  ;;  %v4157_v14 = vpop.permute.xlu0 %823  ;;  %2192 = vperm.xlu1 %2769, %v2132_v49   ;;  %v2148_v31 = vcombine.high %v2132_v49, %v2132_v49 }
 0x155   : > { %vm4163_vm0 = vmor %vm993_vm6, %vm1281_vm8  ;;  %2649 = vmatprep.subr.bf16.mxu0 %v2837_v2  ;;  %vm4935_vm6 = vnez %v4848_v26  ;;  %vm974_vm8 = vcmp.lt.f32.partialorder %v3986_v52, %v3941_v24  ;;  %v2146_v52 = vrot.slane %v2118_v56, %v2976_v15 }
 0x156   : > { %vm1280_vm9 = vmand %vm1120_vm15, %vm4932_vm2  ;;  %vm990_vm2 = vcmp.lt.f32.partialorder %v4016_v59, %v3975_v27 }
 0x157   : > { %vm1408_vm5 = vmor %vm992_vm10, %vm1280_vm9  ;;  %v4176_v20 = vpop.permute.xlu1 %752  ;;  %2200 = vperm.xlu0 %2768, %v2146_v52   ;;  %v2150_v6 = vcombine.high %v2146_v52, %v2146_v52 }
 0x158   : > { %vm2433_vm4 = vmpackc.low %vm4163_vm0, %vm1408_vm5  ;;  %v4183_v54 = vpop.permute.xlu0 %748  ;;  %vm4938_vm0 = vnez %v4850_v28  ;;  %2208 = vperm.xlu1 %2769, %v2148_v31  }
 0x159   : > { %vm1263_vm15 = vmand %vm1103_vm7, %vm4935_vm6  ;;  %2668 = vmatpush3.bf16.msk.msra.mxu1 %vm2433_vm4, %v2840_v42  ;;  %vm1119_vm7 = vcmp.eq.f32.partialorder %v4009_v30, %v3975_v27 }
 0x15a   : > { %vm4191_vm10 = vmor %vm975_vm12, %vm1263_vm15  ;;  %2669 = vmatprep.subr.bf16.mxu1 %v2837_v2  ;;  %vm991_vm12 = vcmp.lt.f32.partialorder %v4009_v30, %v3975_v27 }
 0x15b   : > { %vm1262_vm9 = vmand %vm1102_vm1, %vm4938_vm0  ;;  %v4200_v58 = vpop.permute.xlu1 %819  ;;  %vm1118_vm1 = vcmp.eq.f32.partialorder %v4016_v59, %v3975_v27  ;;  %2216 = vperm.xlu0 %2768, %v2150_v6  }
 0x15c   : > { %vm1390_vm5 = vmor %vm974_vm8, %vm1262_vm9  ;;  %v4205_v0 = vpop.permute.xlu0 %815  ;;  %vm1101_vm9 = vcmp.eq.f32.partialorder %v4037_v9, %v3941_v24 }
 0x15d   : > { %vm2419_vm4 = vmpackc.low %vm4191_vm10, %vm1390_vm5  ;;  %vm973_vm5 = vcmp.lt.f32.partialorder %v4037_v9, %v3941_v24 }
 0x15e   : > { %vm1279_vm15 = vmand %vm1119_vm7, %vm4935_vm6  ;;  %2650 = vmatpush3.bf16.msk.msra.mxu0 %vm2419_vm4, %v2840_v42 }
 0x15f   : > { %vm1407_vm8 = vmor %vm991_vm12, %vm1279_vm15  ;;  %2651 = vmatprep.subr.bf16.mxu0 %v2837_v2  ;;  %v4217_v15 = vpop.permute.xlu1 %744  ;;  %vm1100_vm12 = vcmp.eq.f32.partialorder %v4047_v34, %v3941_v24 }
 0x160   : > { %vm1278_vm10 = vmand %vm1118_vm1, %vm4938_vm0  ;;  %v4223_v30 = vpop.permute.xlu0 %740  ;;  %vm972_vm1 = vcmp.lt.f32.partialorder %v4047_v34, %v3941_v24 }
 0x161   : > { %vm1406_vm7 = vmor %vm990_vm2, %vm1278_vm10  ;;  %vm4939_vm2 = vnez %v4862_v46  ;;  %vm1117_vm10 = vcmp.eq.f32.partialorder %v4061_v12, %v3975_v27 }
 0x162   : > { %vm2435_vm4 = vmpackc.low %vm1407_vm8, %vm1406_vm7 }
 0x163   : > { %vm1261_vm15 = vmand %vm1101_vm9, %vm4908_vm13  ;;  %2670 = vmatpush3.bf16.msk.msra.mxu1 %vm2435_vm4, %v2840_v42  ;;  %v4234_v59 = vpop.permute.xlu1 %811  ;;  %vm989_vm9 = vcmp.lt.f32.partialorder %v4061_v12, %v3975_v27  ;;  %vm1116_vm4 = vcmp.eq.f32.partialorder %v4064_v43, %v3975_v27 }
 0x164   : > { %vm1389_vm0 = vmor %vm973_vm5, %vm1261_vm15  ;;  %2671 = vmatprep.subr.bf16.mxu1 %v2837_v2  ;;  %v4237_v33 = vpop.permute.xlu0 %807  ;;  %vm988_vm15 = vcmp.lt.f32.partialorder %v4064_v43, %v3975_v27 }
 0x165   : > { %vm1260_vm8 = vmand %vm1100_vm12, %vm4939_vm2 }
 0x166   : > { %vm1388_vm7 = vmor %vm972_vm1, %vm1260_vm8  ;;  %vm1099_vm1 = vcmp.eq.f32.partialorder %v4074_v36, %v3941_v24 }
 0x167   : > { %vm2421_vm6 = vmpackc.low %vm1389_vm0, %vm1388_vm7  ;;  %v4247_v9 = vpop.permute.xlu1 %736 }
 0x168   : > { %vm1277_vm5 = vmand %vm1117_vm10, %vm4908_vm13  ;;  %2652 = vmatpush3.bf16.msk.msra.mxu0 %vm2421_vm6, %v2840_v42  ;;  %v4254_v10 = vpop.permute.xlu0 %732  ;;  %vm971_vm10 = vcmp.lt.f32.partialorder %v4074_v36, %v3941_v24  ;;  %vm1098_vm6 = vcmp.eq.f32.partialorder %v4081_v13, %v3941_v24 }
 0x169   : > { %vm1405_vm12 = vmor %vm989_vm9, %vm1277_vm5  ;;  %2653 = vmatprep.subr.bf16.mxu0 %v2837_v2 }
 0x16a   : > { %vm1276_vm0 = vmand %vm1116_vm4, %vm4939_vm2  ;;  %vm970_vm4 = vcmp.lt.f32.partialorder %v4081_v13, %v3941_v24  ;;  %v4301_v13 = vcombine.high %v3912_v4, %v3912_v4 }
 0x16b   : > { %vm1404_vm8 = vmor %vm988_vm15, %vm1276_vm0  ;;  %v4263_v34 = vpop.permute.xlu1 %803 }
 0x16c   : > { %vm2437_vm7 = vmpackc.low %vm1405_vm12, %vm1404_vm8  ;;  %v4267_v12 = vpop.permute.xlu0 %799  ;;  %vm1115_vm12 = vcmp.eq.f32.partialorder %v4090_v35, %v3975_v27  ;;  %vm987_vm8 = vcmp.lt.f32.partialorder %v4090_v35, %v3975_v27 }
 0x16d   : > { %vm1259_vm9 = vmand %vm1099_vm1, %vm4912_vm11  ;;  %2672 = vmatpush3.bf16.msk.msra.mxu1 %vm2437_vm7, %v2840_v42  ;;  %vm1114_vm1 = vcmp.eq.f32.partialorder %v4094_v1, %v3975_v27  ;;  %vm986_vm7 = vcmp.lt.f32.partialorder %v4094_v1, %v3975_v27 }
 0x16e   : > { %vm1387_vm5 = vmor %vm971_vm10, %vm1259_vm9  ;;  %2673 = vmatprep.subr.bf16.mxu1 %v2837_v2 }
 0x16f   : > { %vm1258_vm15 = vmand %vm1098_vm6, %vm4915_vm3  ;;  %v4283_v43 = vpop.permute.xlu1 %728 }
 0x170   : > { %vm1386_vm0 = vmor %vm970_vm4, %vm1258_vm15  ;;  %v4285_v36 = vpop.permute.xlu0 %724  ;;  %vm1097_vm4 = vcmp.eq.f32.partialorder %v4106_v23, %v3941_v24  ;;  %vm969_vm15 = vcmp.lt.f32.partialorder %v4106_v23, %v3941_v24  ;;  %v4321_v23 = vrot.slane %v4301_v13, %v2932_v3 }
 0x171   : > { %vm2423_vm2 = vmpackc.low %vm1387_vm5, %vm1386_vm0  ;;  %vm4940_vm0 = vnez %v4884_v16 }
 0x172   : > { %vm1275_vm10 = vmand %vm1115_vm12, %vm4912_vm11  ;;  %2654 = vmatpush3.bf16.msk.msra.mxu0 %vm2423_vm2, %v2840_v42  ;;  %vm1096_vm2 = vcmp.eq.f32.partialorder %v4110_v32, %v3941_v24 }
 0x173   : > { %vm1403_vm6 = vmor %vm987_vm8, %vm1275_vm10  ;;  %2655 = vmatprep.subr.bf16.mxu0 %v2837_v2  ;;  %v4310_v35 = vpop.permute.xlu1 %795 }
 0x174   : > { %vm1274_vm9 = vmand %vm1114_vm1, %vm4915_vm3  ;;  %vm968_vm1 = vcmp.lt.f32.partialorder %v4110_v32, %v3941_v24  ;;  %v4312_v1 = vpop.permute.xlu0 %791  ;;  %v4327_v24 = vcombine.high %v3946_v38, %v3946_v38 }
 0x175   : > { %vm1402_vm5 = vmor %vm986_vm7, %vm1274_vm9  ;;  %vm4941_vm7 = vnez %v4886_v17  ;;  %vm1113_vm9 = vcmp.eq.f32.partialorder %v4120_v50, %v3975_v27 }
 0x176   : > { %vm2439_vm12 = vmpackc.low %vm1403_vm6, %vm1402_vm5  ;;  %vm985_vm5 = vcmp.lt.f32.partialorder %v4120_v50, %v3975_v27 }
 0x177   : > { %vm1257_vm8 = vmand %vm1097_vm4, %vm4940_vm0  ;;  %2674 = vmatpush3.bf16.msk.msra.mxu1 %vm2439_vm12, %v2840_v42  ;;  %vm1112_vm12 = vcmp.eq.f32.partialorder %v4126_v61, %v3975_v27  ;;  %v4341_v50 = vpop.permute.xlu1 %720 }
 0x178   : > { %vm1385_vm10 = vmor %vm969_vm15, %vm1257_vm8  ;;  %2675 = vmatprep.subr.bf16.mxu1 %v2837_v2  ;;  %vm984_vm8 = vcmp.lt.f32.partialorder %v4126_v61, %v3975_v27  ;;  %v4343_v44 = vpop.permute.xlu0 %716  ;;  %v4351_v27 = vrot.slane %v4327_v24, %v2932_v3 }
 0x179   : > { %vm1256_vm6 = vmand %vm1096_vm2, %vm4941_vm7 }
 0x17a   : > { %vm1384_vm4 = vmor %vm968_vm1, %vm1256_vm6  ;;  %vm1143_vm6 = vcmp.eq.f32.partialorder %v4137_v63, %v4321_v23 }
 0x17b   : > { %vm2425_vm15 = vmpackc.low %vm1385_vm10, %vm1384_vm4  ;;  %vm1015_vm4 = vcmp.lt.f32.partialorder %v4137_v63, %v4321_v23  ;;  %v4372_v61 = vpop.permute.xlu1 %787 }
 0x17c   : > { %vm1273_vm2 = vmand %vm1113_vm9, %vm4940_vm0  ;;  %2656 = vmatpush3.bf16.msk.msra.mxu0 %vm2425_vm15, %v2840_v42  ;;  %vm1142_vm15 = vcmp.eq.f32.partialorder %v4140_v51, %v4321_v23  ;;  %vm4946_vm0 = vnez %v4802_v25  ;;  %v4374_v63 = vpop.permute.xlu0 %783 }
 0x17d   : > { %vm4336_vm1 = vmor %vm985_vm5, %vm1273_vm2  ;;  %2681 = vmatprep.subr.bf16.mxu0 %v2837_v2  ;;  %vm4945_vm2 = vnez %v4804_v29 }
 0x17e   : > { %vm1272_vm10 = vmand %vm1112_vm12, %vm4941_vm7  ;;  %vm4944_vm12 = vmmov 0  }
 0x17f   : > { %vm1400_vm9 = vmor %vm984_vm8, %vm1272_vm10  ;;  %2658 = vmatmul.mubr.bf16.vlgmr.msra.gmra.mxu0 %v2841_v48  ;;  %vm1014_vm8 = vcmp.lt.f32.partialorder %v4140_v51, %v4321_v23  ;;  %v4395_v29 = vpop.permute.xlu1 %712 }
 0x180   : > { %vm2441_vm5 = vmpackc.low %vm4336_vm1, %vm1400_vm9  ;;  %2697 = vmatprep.mubr.msk.bf16.mxu0 %vm4944_vm12, %v2837_v2  ;;  %vm1159_vm9 = vcmp.eq.f32.partialorder %v4150_v11, %v4351_v27  ;;  %v4397_v51 = vpop.permute.xlu0 %708 }
 0x181   : > { %vm1303_vm7 = vmand %vm1143_vm6, %vm4945_vm2  ;;  %2676 = vmatpush3.bf16.msk.msra.mxu1 %vm2441_vm5, %v2840_v42  ;;  %vm1031_vm6 = vcmp.lt.f32.partialorder %v4150_v11, %v4351_v27 }
 0x182   : > { %vm1431_vm10 = vmor %vm1015_vm4, %vm1303_vm7  ;;  %2701 = vmatprep.subr.bf16.mxu1 %v2837_v2  ;;  %vm1158_vm7 = vcmp.eq.f32.partialorder %v4157_v14, %v4351_v27 }
 0x183   : > { %vm1302_vm1 = vmand %vm1142_vm15, %vm4946_vm0  ;;  %vm1030_vm15 = vcmp.lt.f32.partialorder %v4157_v14, %v4351_v27  ;;  %v4415_v25 = vpop.permute.xlu1 %779 }
 0x184   : > { %vm1430_vm3 = vmor %vm1014_vm8, %vm1302_vm1  ;;  %2678 = vmatmul.mubr.bf16.vlgmr.msra.gmra.mxu1 %v2841_v48  ;;  %v4417_v11 = vpop.permute.xlu0 %775 }
 0x185   : > { %vm2443_vm5 = vmpackc.low %vm1431_vm10, %vm1430_vm3  ;;  %2717 = vmatprep.mubr.msk.bf16.mxu1 %vm4944_vm12, %v2837_v2  ;;  %vm1141_vm10 = vcmp.eq.f32.partialorder %v4176_v20, %v4321_v23  ;;  %vm1013_vm12 = vcmp.lt.f32.partialorder %v4176_v20, %v4321_v23 }
 0x186   : > { %vm1319_vm4 = vmand %vm1159_vm9, %vm4945_vm2  ;;  %2682 = vmatpush3.bf16.msk.msra.mxu0 %vm2443_vm5, %v2840_v42  ;;  %vm1140_vm9 = vcmp.eq.f32.partialorder %v4183_v54, %v4321_v23 }
 0x187   : > { %vm1447_vm8 = vmor %vm1031_vm6, %vm1319_vm4  ;;  %2683 = vmatprep.subr.bf16.mxu0 %v2837_v2  ;;  %vm4947_vm6 = vnez %v4812_v37  ;;  %vm4948_vm4 = vnez %v4814_v39  ;;  %v4438_v37 = vpop.permute.xlu1 %704 }
 0x188   : > { %vm1318_vm3 = vmand %vm1158_vm7, %vm4946_vm0  ;;  %vm1012_vm0 = vcmp.lt.f32.partialorder %v4183_v54, %v4321_v23  ;;  %v4440_v39 = vpop.permute.xlu0 %700 }
 0x189   : > { %vm1446_vm1 = vmor %vm1030_vm15, %vm1318_vm3 }
 0x18a   : > { %vm2459_vm2 = vmpackc.low %vm1447_vm8, %vm1446_vm1  ;;  %vm1157_vm8 = vcmp.eq.f32.partialorder %v4200_v58, %v4351_v27  ;;  %vm1029_vm1 = vcmp.lt.f32.partialorder %v4200_v58, %v4351_v27 }
 0x18b   : > { %vm1301_vm5 = vmand %vm1141_vm10, %vm4947_vm6  ;;  %2702 = vmatpush3.bf16.msk.msra.mxu1 %vm2459_vm2, %v2840_v42  ;;  %vm1156_vm10 = vcmp.eq.f32.partialorder %v4205_v0, %v4351_v27  ;;  %vm1028_vm2 = vcmp.lt.f32.partialorder %v4205_v0, %v4351_v27  ;;  %v4457_v14 = vpop.permute.xlu1 %771 }
 0x18c   : > { %vm1429_vm7 = vmor %vm1013_vm12, %vm1301_vm5  ;;  %2703 = vmatprep.subr.bf16.mxu1 %v2837_v2  ;;  %v4459_v40 = vpop.permute.xlu0 %767 }
 0x18d   : > { %vm1300_vm15 = vmand %vm1140_vm9, %vm4948_vm4 }
 0x18e   : > { %vm1428_vm3 = vmor %vm1012_vm0, %vm1300_vm15  ;;  %vm1139_vm0 = vcmp.eq.f32.partialorder %v4217_v15, %v4321_v23  ;;  %vm1011_vm15 = vcmp.lt.f32.partialorder %v4217_v15, %v4321_v23 }
 0x18f   : > { %vm2445_vm11 = vmpackc.low %vm1429_vm7, %vm1428_vm3 }
 0x190   : > { %vm1317_vm12 = vmand %vm1157_vm8, %vm4947_vm6  ;;  %2684 = vmatpush3.bf16.msk.msra.mxu0 %vm2445_vm11, %v2840_v42  ;;  %vm1138_vm6 = vcmp.eq.f32.partialorder %v4223_v30, %v4321_v23  ;;  %vm4949_vm8 = vnez %v4824_v53 }
 0x191   : > { %vm1445_vm9 = vmor %vm1029_vm1, %vm1317_vm12  ;;  %2685 = vmatprep.subr.bf16.mxu0 %v2837_v2  ;;  %vm1010_vm1 = vcmp.lt.f32.partialorder %v4223_v30, %v4321_v23 }
 0x192   : > { %vm1316_vm5 = vmand %vm1156_vm10, %vm4948_vm4  ;;  %vm4950_vm10 = vnez %v4826_v55 }
 0x193   : > { %vm1444_vm7 = vmor %vm1028_vm2, %vm1316_vm5  ;;  %vm1155_vm2 = vcmp.eq.f32.partialorder %v4234_v59, %v4351_v27  ;;  %vm1027_vm5 = vcmp.lt.f32.partialorder %v4234_v59, %v4351_v27 }
 0x194   : > { %vm2461_vm3 = vmpackc.low %vm1445_vm9, %vm1444_vm7  ;;  %vm1154_vm7 = vcmp.eq.f32.partialorder %v4237_v33, %v4351_v27 }
 0x195   : > { %vm1299_vm11 = vmand %vm1139_vm0, %vm4949_vm8  ;;  %2704 = vmatpush3.bf16.msk.msra.mxu1 %vm2461_vm3, %v2840_v42 }
 0x196   : > { %vm1427_vm4 = vmor %vm1011_vm15, %vm1299_vm11  ;;  %2705 = vmatprep.subr.bf16.mxu1 %v2837_v2  ;;  %vm1026_vm15 = vcmp.lt.f32.partialorder %v4237_v33, %v4351_v27 }
 0x197   : > { %vm1298_vm12 = vmand %vm1138_vm6, %vm4950_vm10 }
 0x198   : > { %vm1426_vm9 = vmor %vm1010_vm1, %vm1298_vm12  ;;  %vm1137_vm1 = vcmp.eq.f32.partialorder %v4247_v9, %v4321_v23 }
 0x199   : > { %vm2447_vm0 = vmpackc.low %vm1427_vm4, %vm1426_vm9  ;;  %v2012_v55 = vpop.permute.xlu0 %2011 }
 0x19a   : > { %vm1315_vm3 = vmand %vm1155_vm2, %vm4949_vm8  ;;  %2686 = vmatpush3.bf16.msk.msra.mxu0 %vm2447_vm0, %v2840_v42  ;;  %vm1009_vm8 = vcmp.lt.f32.partialorder %v4247_v9, %v4321_v23  ;;  %vm1136_vm2 = vcmp.eq.f32.partialorder %v4254_v10, %v4321_v23  ;;  %vm4951_vm0 = vnez %v4838_v8  ;;  %v2017_v7 = vrot.slane %v2012_v55, %v2932_v3 }
 0x19b   : > { %vm1443_vm6 = vmor %vm1027_vm5, %vm1315_vm3  ;;  %2687 = vmatprep.subr.bf16.mxu0 %v2837_v2  ;;  %vm1008_vm5 = vcmp.lt.f32.partialorder %v4254_v10, %v4321_v23  ;;  %v2020_v53 = vpop.permute.xlu1 %2019  ;;  %vm1153_vm3 = vcmp.eq.f32.partialorder %v4263_v34, %v4351_v27 }
 0x19c   : > { %vm1314_vm11 = vmand %vm1154_vm7, %vm4950_vm10  ;;  %v2025_v8 = vrot.slane %v2020_v53, %v2932_v3 }
 0x19d   : > { %vm1442_vm4 = vmor %vm1026_vm15, %vm1314_vm11  ;;  %v4490_v41 = vpop.permute.xlu0 %2035 }
 0x19e   : > { %vm2463_vm12 = vmpackc.low %vm1443_vm6, %vm1442_vm4  ;;  %vm1025_vm6 = vcmp.lt.f32.partialorder %v4263_v34, %v4351_v27 }
 0x19f   : > { %vm1297_vm9 = vmand %vm1137_vm1, %vm4931_vm14  ;;  %2706 = vmatpush3.bf16.msk.msra.mxu1 %vm2463_vm12, %v2840_v42  ;;  %vm1152_vm1 = vcmp.eq.f32.partialorder %v4267_v12, %v4351_v27  ;;  %v4483_v47 = vpop.permute.xlu1 %2027 }
 0x1a0   : > { %vm1425_vm10 = vmor %vm1009_vm8, %vm1297_vm9  ;;  %2707 = vmatprep.subr.bf16.mxu1 %v2837_v2  ;;  %vm1024_vm8 = vcmp.lt.f32.partialorder %v4267_v12, %v4351_v27  ;;  %vm1135_vm9 = vcmp.eq.f32.partialorder %v4283_v43, %v4321_v23  ;;  %v2033_v45 = vrot.slane %v4483_v47, %v2932_v3 }
 0x1a1   : > { %vm1296_vm7 = vmand %vm1136_vm2, %vm4951_vm0  ;;  %v1674_v5 = vpop.f32.mrf.mxu0 }
 0x1a2   : > { %vm1424_vm15 = vmor %vm1008_vm5, %vm1296_vm7  ;;  %vm1134_vm7 = vcmp.eq.f32.partialorder %v4285_v36, %v4321_v23 }
 0x1a3   : > { %vm2449_vm11 = vmpackc.low %vm1425_vm10, %vm1424_vm15  ;;  %v2579_v20 = vpop.f32.mrf.mxu0  ;;  %v4502_v56 = vpop.permute.xlu1 %2043 }
 0x1a4   : > { %vm1313_vm4 = vmand %vm1153_vm3, %vm4931_vm14  ;;  %2688 = vmatpush3.bf16.msk.msra.mxu0 %vm2449_vm11, %v2840_v42  ;;  %vm1007_vm14 = vcmp.lt.f32.partialorder %v4283_v43, %v4321_v23  ;;  %vm4952_vm3 = vnez %v4848_v26  ;;  %v4510_v57 = vpop.permute.xlu0 %2051  ;;  %vm4955_vm11 = vnez %v4850_v28 }
 0x1a5   : > { %vm1441_vm12 = vmor %vm1025_vm6, %vm1313_vm4  ;;  %2689 = vmatprep.subr.bf16.mxu0 %v2837_v2  ;;  %v1677_v54 = vpop.f32.mrf.mxu0  ;;  %vm1151_vm4 = vcmp.eq.f32.partialorder %v4310_v35, %v4351_v27 }
 0x1a6   : > { %vm1312_vm2 = vmand %vm1152_vm1, %vm4951_vm0  ;;  %vm1006_vm0 = vcmp.lt.f32.partialorder %v4285_v36, %v4321_v23 }
 0x1a7   : > { %vm1440_vm5 = vmor %vm1024_vm8, %vm1312_vm2  ;;  %v2580_v49 = vpop.f32.mrf.mxu0  ;;  %vm2074_vm8 = vcmp.lt.f32.partialorder %v1674_v5, %v2017_v7  ;;  %vm1023_vm2 = vcmp.lt.f32.partialorder %v4310_v35, %v4351_v27  ;;  %v4527_v0 = vpop.permute.xlu1 %2059 }
 0x1a8   : > { %vm2465_vm10 = vmpackc.low %vm1441_vm12, %vm1440_vm5  ;;  %vm1150_vm5 = vcmp.eq.f32.partialorder %v4312_v1, %v4351_v27  ;;  %v2475_v15 = vsel %vm2074_vm8, 1.0, %v2837_v2  ;;  %v4535_v30 = vpop.permute.xlu0 %2067  ;;  %vm1132_vm8 = vcmp.eq.f32.partialorder %v4343_v44, %v4321_v23 }
 0x1a9   : > { %vm1295_vm15 = vmand %vm1135_vm9, %vm4952_vm3  ;;  %2708 = vmatpush3.bf16.msk.msra.mxu1 %vm2465_vm10, %v2840_v42  ;;  %v1714_v58 = vpop.f32.mrf.mxu1  ;;  %v2151_v9 = vmul.f32 %v2475_v15, %v2987_v18 }
 0x1aa   : > { %vm4512_vm6 = vmor %vm1007_vm14, %vm1295_vm15  ;;  %2709 = vmatprep.subr.bf16.mxu1 %v2837_v2  ;;  %vm2075_vm14 = vcmp.lt.f32.partialorder %v1714_v58, %v2025_v8 }
 0x1ab   : > { %vm1294_vm1 = vmand %vm1134_vm7, %vm4955_vm11  ;;  %v2599_v31 = vpop.f32.mrf.mxu1  ;;  %vm1022_vm7 = vcmp.lt.f32.partialorder %v4312_v1, %v4351_v27  ;;  %v2476_v26 = vsel %vm2075_vm14, 1.0, %v2837_v2  ;;  %vm1149_vm14 = vcmp.eq.f32.partialorder %v4372_v61, %v4351_v27 }
 0x1ac   : > { %vm1422_vm12 = vmor %vm1006_vm0, %vm1294_vm1  ;;  %vm1133_vm0 = vcmp.eq.f32.partialorder %v4341_v50, %v4321_v23  ;;  %vm1005_vm1 = vcmp.lt.f32.partialorder %v4341_v50, %v4321_v23  ;;  %v2152_v10 = vmul.f32 %v2476_v26, %v2990_v19 }
 0x1ad   : > { %vm2451_vm9 = vmpackc.low %vm4512_vm6, %vm1422_vm12  ;;  %v1717_v6 = vpop.f32.mrf.mxu1  ;;  %vm1004_vm12 = vcmp.lt.f32.partialorder %v4343_v44, %v4321_v23 }
 0x1ae   : > { %vm1311_vm10 = vmand %vm1151_vm4, %vm4952_vm3  ;;  %2690 = vmatpush3.bf16.msk.msra.mxu0 %vm2451_vm9, %v2840_v42  ;;  %v2161_v28 = vpop.permute.xlu1 %2160  ;;  %vm4960_vm9 = vnez %v4862_v46 }
 0x1af   : > { %vm4538_vm15 = vmor %vm1023_vm2, %vm1311_vm10  ;;  %2691 = vmatprep.subr.bf16.mxu0 %v2837_v2  ;;  %v2600_v33 = vpop.f32.mrf.mxu1  ;;  %v2166_v18 = vrot.slane %v2161_v28, %v2932_v3 }
 0x1b0   : > { %vm1310_vm3 = vmand %vm1150_vm5, %vm4955_vm11  ;;  %v2169_v12 = vpop.permute.xlu0 %2168  ;;  %v2073_v33 = vrot.slane %v4535_v30, %v2932_v3 }
 0x1b1   : > { %vm1438_vm6 = vmor %vm1022_vm7, %vm1310_vm3  ;;  %v2223_v43 = vmul.f32 %v2166_v18, %v2151_v9  ;;  %v2174_v36 = vrot.slane %v2169_v12, %v2932_v3  ;;  %vm1021_vm7 = vcmp.lt.f32.partialorder %v4372_v61, %v4351_v27  ;;  %vm1148_vm3 = vcmp.eq.f32.partialorder %v4374_v63, %v4351_v27 }
 0x1b2   : > { %vm2467_vm4 = vmpackc.low %vm4538_vm15, %vm1438_vm6  ;;  %vm1020_vm6 = vcmp.lt.f32.partialorder %v4374_v63, %v4351_v27  ;;  %v2177_v46 = vpop.permute.xlu1 %2176 }
 0x1b3   : > { %vm1293_vm11 = vmand %vm1133_vm0, %vm4908_vm13  ;;  %2710 = vmatpush3.bf16.msk.msra.mxu1 %vm2467_vm4, %v2840_v42  ;;  %2231 = vst [vmem:[%s4580_s16] sm:$0x1] %v2223_v43  ;;  %v2224_v19 = vmul.f32 %v2174_v36, %v2152_v10 }
 0x1b4   : > { %vm4564_vm2 = vmor %vm1005_vm1, %vm1293_vm11  ;;  %2711 = vmatprep.subr.bf16.mxu1 %v2837_v2 }
 0x1b5   : > { %vm1292_vm5 = vmand %vm1132_vm8, %vm4960_vm9  ;;  %2232 = vst [vmem:[%s4580_s16 + $0x1] sm:$0x1] %v2224_v19  ;;  %vm1131_vm8 = vcmp.eq.f32.partialorder %v4395_v29, %v4321_v23 }
 0x1b6   : > { %vm1420_vm10 = vmor %vm1004_vm12, %vm1292_vm5  ;;  %vm1003_vm12 = vcmp.lt.f32.partialorder %v4395_v29, %v4321_v23  ;;  %vm4961_vm5 = vnez %v4872_v60 }
 0x1b7   : > { %vm2453_vm15 = vmpackc.low %vm4564_vm2, %vm1420_vm10  ;;  %vm1130_vm2 = vcmp.eq.f32.partialorder %v4397_v51, %v4321_v23  ;;  %vm1002_vm10 = vcmp.lt.f32.partialorder %v4397_v51, %v4321_v23 }
 0x1b8   : > { %vm1309_vm0 = vmand %vm1149_vm14, %vm4908_vm13  ;;  %2692 = vmatpush3.bf16.msk.msra.mxu0 %vm2453_vm15, %v2840_v42 }
 0x1b9   : > { %vm1437_vm1 = vmor %vm1021_vm7, %vm1309_vm0  ;;  %2693 = vmatprep.subr.bf16.mxu0 %v2837_v2  ;;  %vm4962_vm7 = vnez %v4874_v62  ;;  %v2182_v62 = vrot.slane %v2177_v46, %v2932_v3 }
 0x1ba   : > { %vm1308_vm4 = vmand %vm1148_vm3, %vm4960_vm9  ;;  %vm1147_vm3 = vcmp.eq.f32.partialorder %v4415_v25, %v4351_v27 }
 0x1bb   : > { %vm1436_vm11 = vmor %vm1020_vm6, %vm1308_vm4  ;;  %vm1019_vm6 = vcmp.lt.f32.partialorder %v4415_v25, %v4351_v27  ;;  %vm1146_vm4 = vcmp.eq.f32.partialorder %v4417_v11, %v4351_v27 }
 0x1bc   : > { %vm2469_vm13 = vmpackc.low %vm1437_vm1, %vm1436_vm11  ;;  %vm1018_vm11 = vcmp.lt.f32.partialorder %v4417_v11, %v4351_v27 }
 0x1bd   : > { %vm1291_vm14 = vmand %vm1131_vm8, %vm4961_vm5  ;;  %2712 = vmatpush3.bf16.msk.msra.mxu1 %vm2469_vm13, %v2840_v42 }
 0x1be   : > { %vm1419_vm9 = vmor %vm1003_vm12, %vm1291_vm14  ;;  %2713 = vmatprep.subr.bf16.mxu1 %v2837_v2 }
 0x1bf   : > { %vm1290_vm15 = vmand %vm1130_vm2, %vm4962_vm7  ;;  %vm1129_vm2 = vcmp.eq.f32.partialorder %v4438_v37, %v4321_v23 }
 0x1c0   : > { %vm1418_vm0 = vmor %vm1002_vm10, %vm1290_vm15  ;;  %vm1001_vm10 = vcmp.lt.f32.partialorder %v4438_v37, %v4321_v23  ;;  %vm4963_vm15 = vnez %v4884_v16  ;;  %v2041_v16 = vrot.slane %v4490_v41, %v2932_v3 }
 0x1c1   : > { %vm2455_vm1 = vmpackc.low %vm1419_vm9, %vm1418_vm0  ;;  %vm1000_vm0 = vcmp.lt.f32.partialorder %v4440_v39, %v4321_v23 }
 0x1c2   : > { %vm1307_vm8 = vmand %vm1147_vm3, %vm4961_vm5  ;;  %2694 = vmatpush3.bf16.msk.msra.mxu0 %vm2455_vm1, %v2840_v42  ;;  %vm1128_vm5 = vcmp.eq.f32.partialorder %v4440_v39, %v4321_v23 }
 0x1c3   : > { %vm1435_vm12 = vmor %vm1019_vm6, %vm1307_vm8  ;;  %2695 = vmatprep.subr.bf16.mxu0 %v2837_v2  ;;  %vm4964_vm6 = vnez %v4886_v17 }
 0x1c4   : > { %vm1306_vm13 = vmand %vm1146_vm4, %vm4962_vm7  ;;  %vm1145_vm4 = vcmp.eq.f32.partialorder %v4457_v14, %v4351_v27 }
 0x1c5   : > { %vm1434_vm14 = vmor %vm1018_vm11, %vm1306_vm13  ;;  %vm1017_vm11 = vcmp.lt.f32.partialorder %v4457_v14, %v4351_v27  ;;  %vm1144_vm13 = vcmp.eq.f32.partialorder %v4459_v40, %v4351_v27  ;;  %v2057_v14 = vrot.slane %v4510_v57, %v2932_v3 }
 0x1c6   : > { %vm2471_vm9 = vmpackc.low %vm1435_vm12, %vm1434_vm14  ;;  %vm1016_vm14 = vcmp.lt.f32.partialorder %v4459_v40, %v4351_v27 }
 0x1c7   : > { %vm1289_vm3 = vmand %vm1129_vm2, %vm4963_vm15  ;;  %2714 = vmatpush3.bf16.msk.msra.mxu1 %vm2471_vm9, %v2840_v42 }
 0x1c8   : > { %vm1417_vm7 = vmor %vm1001_vm10, %vm1289_vm3  ;;  %2715 = vmatprep.subr.bf16.mxu1 %v2837_v2 }
 0x1c9   : > { %vm1288_vm1 = vmand %vm1128_vm5, %vm4964_vm6 }
 0x1ca   : > { %vm1416_vm8 = vmor %vm1000_vm0, %vm1288_vm1 }
 0x1cb   : > { %vm2457_vm12 = vmpackc.low %vm1417_vm7, %vm1416_vm8 }
 0x1cc   : > { %vm1305_vm2 = vmand %vm1145_vm4, %vm4963_vm15  ;;  %2696 = vmatpush3.bf16.msk.msra.mxu0 %vm2457_vm12, %v2840_v42  ;;  %v2185_v1 = vpop.permute.xlu0 %2184 }
 0x1cd   : > { %vm1433_vm10 = vmor %vm1017_vm11, %vm1305_vm2  ;;  %v2190_v44 = vrot.slane %v2185_v1, %v2932_v3 }
 0x1ce   : > { %vm1304_vm9 = vmand %vm1144_vm13, %vm4964_vm6 }
 0x1cf   : > { %vm1432_vm5 = vmor %vm1016_vm14, %vm1304_vm9  ;;  %2698 = vmatmul.mubr.bf16.vlgmr.msra.gmra.mxu0 %v2841_v48  ;;  %v2193_v11 = vpop.permute.xlu1 %2192 }
 0x1d0   : > { %vm2473_vm3 = vmpackc.low %vm1433_vm10, %vm1432_vm5  ;;  %v2198_v39 = vrot.slane %v2193_v11, %v2932_v3 }
 0x1d1   : > { %2716 = vmatpush3.bf16.msk.msra.mxu1 %vm2473_vm3, %v2840_v42 }
 0x1d2   : > { %v2201_v55 = vpop.permute.xlu0 %2200 }
 0x1d3   : > { %v2206_v54 = vrot.slane %v2201_v55, %v2932_v3  ;;  %v2209_v52 = vpop.permute.xlu1 %2208 }
 0x1d4   : > { %2718 = vmatmul.mubr.bf16.vlgmr.msra.gmra.mxu1 %v2841_v48  ;;  %v2214_v59 = vrot.slane %v2209_v52, %v2932_v3 }
 0x1d6   : > { %v2217_v9 = vpop.permute.xlu0 %2216 }
 0x1ef   : > { %v1754_v60 = vpop.f32.mrf.mxu0 }
 0x1f0   : > { %vm2076_vm15 = vcmp.lt.f32.partialorder %v1754_v60, %v2033_v45 }
 0x1f1   : > { %v2477_v17 = vsel %vm2076_vm15, 1.0, %v2837_v2  ;;  %v2619_v35 = vpop.f32.mrf.mxu0 }
 0x1f2   : > { %v2153_v42 = vmul.f32 %v2477_v17, %v3463_v21  ;;  %v2049_v21 = vrot.slane %v4502_v56, %v2932_v3 }
 0x1f3   : > { %v1757_v48 = vpop.f32.mrf.mxu0 }
 0x1f4   : > { %v1794_v23 = vpop.f32.mrf.mxu1  ;;  %v2225_v32 = vmul.f32 %v2182_v62, %v2153_v42 }
 0x1f5   : > { %vm2077_vm0 = vcmp.lt.f32.partialorder %v1794_v23, %v2041_v16  ;;  %v2620_v50 = vpop.f32.mrf.mxu0 }
 0x1f6   : > { %v2478_v27 = vsel %vm2077_vm0, 1.0, %v2837_v2  ;;  %v2639_v61 = vpop.f32.mrf.mxu1  ;;  %2233 = vst [vmem:[%s4580_s16 + $0x2] sm:$0x1] %v2225_v32 }
 0x1f7   : > { %v2154_v63 = vmul.f32 %v2478_v27, %v3532_v22 }
 0x1f8   : > { %v1797_v29 = vpop.f32.mrf.mxu1 }
 0x1f9   : > { %v2226_v51 = vmul.f32 %v2190_v44, %v2154_v63 }
 0x1fa   : > { %v2640_v25 = vpop.f32.mrf.mxu1 }
 0x1fb   : > { %2234 = vst [vmem:[%s4580_s16 + $0x3] sm:$0x1] %v2226_v51 }
 0x23f   : > { %v1834_v37 = vpop.f32.mrf.mxu0 }
 0x240   : > { %vm2078_vm7 = vcmp.lt.f32.partialorder %v1834_v37, %v2049_v21 }
 0x241   : > { %v2479_v40 = vsel %vm2078_vm7, 1.0, %v2837_v2  ;;  %v2659_v53 = vpop.f32.mrf.mxu0 }
 0x242   : > { %v2155_v22 = vmul.f32 %v2479_v40, %v3912_v4  ;;  %v2065_v4 = vrot.slane %v4527_v0, %v2932_v3 }
 0x243   : > { %v1837_v5 = vpop.f32.mrf.mxu0 }
 0x244   : > { %v1874_v47 = vpop.f32.mrf.mxu1  ;;  %v2227_v20 = vmul.f32 %v2198_v39, %v2155_v22 }
 0x245   : > { %vm2079_vm6 = vcmp.lt.f32.partialorder %v1874_v47, %v2057_v14  ;;  %v2660_v41 = vpop.f32.mrf.mxu0 }
 0x246   : > { %v2480_v7 = vsel %vm2079_vm6, 1.0, %v2837_v2  ;;  %v2679_v49 = vpop.f32.mrf.mxu1  ;;  %2235 = vst [vmem:[%s4580_s16 + $0x4] sm:$0x1] %v2227_v20 }
 0x247   : > { %v2156_v56 = vmul.f32 %v2480_v7, %v3946_v38 }
 0x248   : > { %v1877_v8 = vpop.f32.mrf.mxu1 }
 0x249   : > { %v2228_v57 = vmul.f32 %v2206_v54, %v2156_v56 }
 0x24a   : > { %v2680_v58 = vpop.f32.mrf.mxu1 }
 0x24b   : > { %2236 = vst [vmem:[%s4580_s16 + $0x5] sm:$0x1] %v2228_v57 }
 0x28f   : > { %v1914_v31 = vpop.f32.mrf.mxu0 }
 0x290   : > { %vm2080_vm1 = vcmp.lt.f32.partialorder %v1914_v31, %v2065_v4 }
 0x291   : > { %v2481_v6 = vsel %vm2080_vm1, 1.0, %v2837_v2  ;;  %v2699_v15 = vpop.f32.mrf.mxu0 }
 0x292   : > { %v2157_v38 = vmul.f32 %v2481_v6, %v4301_v13  ;;  %v2222_v13 = vrot.slane %v2217_v9, %v2932_v3 }
 0x293   : > { %v1917_v26 = vpop.f32.mrf.mxu0 }
 0x294   : > { %v2229_v28 = vmul.f32 %v2214_v59, %v2157_v38  ;;  %v1954_v0 = vpop.f32.mrf.mxu1 }
 0x295   : > { %vm2081_vm4 = vcmp.lt.f32.partialorder %v1954_v0, %v2073_v33  ;;  %v2700_v10 = vpop.f32.mrf.mxu0 }
 0x296   : > { %2237 = vst [vmem:[%s4580_s16 + $0x6] sm:$0x1] %v2229_v28  ;;  %v2482_v18 = vsel %vm2081_vm4, 1.0, %v2837_v2  ;;  %v2719_v34 = vpop.f32.mrf.mxu1 }
 0x297   : > { %v2158_v12 = vmul.f32 %v2482_v18, %v4327_v24 }
 0x298   : > { %v1957_v30 = vpop.f32.mrf.mxu1 }
 0x299   : > { %v2230_v43 = vmul.f32 %v2222_v13, %v2158_v12 }
 0x29a   : > { %v2720_v36 = vpop.f32.mrf.mxu1 }
 0x29b   : > { %2238 = vst [vmem:[%s4580_s16 + $0x7] sm:$0x1] %v2230_v43 }
 0x29c   : > { %2788 = shalt.err (!%p2785_p3)
}
 0x29d   : > { %s2789_s8 = scalar_lea.hbm %s4690_s29, 128  ;;  %s2793_s11 = scalar_lea.hbm %s4741_s4, 256 }
 0x29e   : > { %p2790_p4 = scmp.ne.s32.totalorder %s4690_s29, %s2789_s8  ;;  %p2794_p9 = scmp.lt.s32.totalorder %s4690_s29, %s4741_s4 }
 0x29f   : > { %p2795_p10 = scmp.lt.s32.totalorder %s2793_s11, %s2789_s8 }
 0x2a0   : > { %p2791_p7 = pnand %p2790_p4, %p2912_p5 }
 0x2a1   : > { %p2796_p11 = por %p2795_p10, %p2794_p9 }
 0x2a2   : > { %p2792_p8 = pneg %p2791_p7 }
 0x2a4   : > { %p2797_p12 = pnand %p2796_p11, %p2792_p8 }
 0x2a6   : > { %2800 = shalt.err (!%p2797_p12)
}
 0x2a7   : > { %s2844_s14 = smov 16   ;;  %s2845_s15 = smov 1  }
 0x2a8   : > { %2721 = dma.vmem_to_hbm [thread:$0]  (%p2912_p5), %s4692_s23, 128, %s4690_s29, %s4697_s0, %s2844_s14, %s2844_s14, %s2845_s15  }
 0x2a9 PF: > { %p2727_p13 = scmp.ge.s32.totalorder %s2835_s20, 2  ;;  %s2268_s16 = sand.u32 1, %s2823_s17  }
 0x2aa   : > { %s2269_s21 = scalar_lea.sflag [#allocation4], %s2268_s16 }
 0x2ab   : > { %p2724_p0 = pnand %p2727_p13, %p2916_p6 }
 0x2ad   : > { %p2725_p1 = pneg %p2724_p0 }
 0x2af   : > { %2818 = dma.done.wait (%p2725_p1), %s2269_s21, 128  }
 0x2b0   : > { %2820 = vsyncadd (%p2725_p1), %s2269_s21, 4294967168  ;;  %p15_p2 = scmp.ge.s32.totalorder %s2899_s22, 4   ;;  %s4965_s17 = smov %s2827_s18 }
 0x2b1   : > { %s4966_s18 = smov %s2831_s19  ;;  %s4967_s19 = smov %s2910_s25 }
 0x2b2   : > { %s4968_s20 = smov %s2899_s22  ;;  %17 = sbr.rel (!%p15_p2) target bundleno = 5 (0x5), region = 77 }
 0x2b7   :  { %2274 = vsyncpa [#allocation4], 1 }
 0x2b8   :  { %2276 = vsyncpa [#allocation4 + $0x1], 1 }

</bundles_post_ra>
